<compile_context>
chip_gen: v7x
topology: tpu7x:2x2x1
jax: 0.10.0
libtpu: 0.0.40
codegen_flags: <defaults>
</compile_context>

<pallas_src>
import jax
import jax.numpy as jnp
from jax import lax
from jax.experimental import pallas as pl
from jax.experimental.pallas import tpu as pltpu

LANE = 128
SUBLANE = 8
VMEM_BUDGET_BYTES = 40 * 1024 * 1024   # per-step footprint cap (v7x: 64 MiB phys)
VMEM_LIMIT_BYTES = 48 * 1024 * 1024    # scoped-VMEM limit handed to Mosaic
MIN_GRID_STEPS = 8                     # keep both v7x TensorCores fed


def make_divisible(v, divisor=8, min_value=None):
    if min_value is None:
        min_value = divisor
    new_v = max(min_value, int(v + divisor / 2) // divisor * divisor)
    if new_v < 0.9 * v:
        new_v += divisor
    return new_v


def _round_up(x, m):
    return (x + m - 1) // m * m


def _cdiv(a, b):
    return (a + b - 1) // b


# TODO(synk): BatchNorm is folded with running statistics (inference mode);
# train-mode batch-statistic updates are not modeled.
def _fold_bn(w_out_last, gamma, beta, mean, var, eps=1e-5):
    scale = gamma / jnp.sqrt(var + eps)
    return w_out_last * scale, beta - mean * scale


# ---------------------------------------------------------------------------
# Fused kernel: expand (1x1, MXU, bf16) -> depthwise 3x3 (VPU, f32 acc)
#               -> project (1x1, MXU, bf16) -> shortcut -> ReLU
# Grid: (N, Ho_pad // th).  Each step computes `th` output rows.
# shortcut_mode: 0 = none, 1 = identity from resident input (stride 1),
#                2 = streamed bf16 shortcut (avg-pool, stride > 1)
# ---------------------------------------------------------------------------
def _make_block_kernel(th, stride, Wq, Wp_pad, shortcut_mode):
    rows_main = th * stride          # padded-input rows owned by this tile
    rows_in = rows_main + 2          # + 2-row depthwise halo
    assert rows_main % 2 == 0, "halo BlockSpec index map requires an even main window"
    if shortcut_mode == 1:
        assert stride == 1

    def body(xm_ref, xh_ref, w1_ref, wd_ref, bd_ref, wp_ref, bp_ref,
             sc_ref, o_ref, t_ref, d_ref):
        cin_p = xm_ref.shape[-1]
        cexp_p = w1_ref.shape[-1]
        cout_p = wp_ref.shape[-1]
        f32 = jnp.float32

        # ---- 1x1 expand conv (+ folded BN + ReLU): bf16 MXU, f32 accumulate.
        # The folded bias rides a constant "ones" input channel, so zero-padded
        # border pixels expand to exactly zero (free depthwise halo).
        xm = xm_ref[0].reshape(rows_main * Wp_pad, cin_p)   # free: Wp_pad % 8 == 0
        xh = xh_ref[0].reshape(2 * Wp_pad, cin_p)
        t_ref[0:rows_main] = jnp.maximum(
            jnp.dot(xm, w1_ref[...], preferred_element_type=f32), 0.0
        ).reshape(rows_main, Wp_pad, cexp_p).astype(t_ref.dtype)
        t_ref[rows_main:rows_in] = jnp.maximum(
            jnp.dot(xh, w1_ref[...], preferred_element_type=f32), 0.0
        ).reshape(2, Wp_pad, cexp_p).astype(t_ref.dtype)

        wd = wd_ref[...]            # (9, 1, Cexp_p) f32 taps
        bd = bd_ref[...]            # (1, Cexp_p)
        bp = bp_ref[...]            # (1, Cout_p)

        # ---- 3x3 depthwise (+ folded BN + ReLU) -----------------------------
        # Expanded activation stays in bf16 scratch; the 9-tap accumulator is
        # kept one output row at a time in f32 so intermediates stay small
        # (no full-tile per-tap arrays), writing bf16 rows into d_ref.
        for r in range(th):
            acc = None
            for ky in range(3):
                row = t_ref[r * stride + ky].astype(f32)    # (Wp_pad, Cexp_p)
                for kx in range(3):
                    if stride == 1:
                        win = row[kx:kx + Wq, :]
                    else:
                        # stride-2 columns: subsample per tap, no dense compute
                        win = row[kx:kx + 2 * Wq - 1:2, :]
                    tap = win * wd[3 * ky + kx]
                    acc = tap if acc is None else acc + tap
            d_ref[r * Wq:(r + 1) * Wq, :] = jnp.maximum(acc + bd, 0.0).astype(d_ref.dtype)

        # ---- 1x1 project conv (+ folded BN): one MXU dot over all rows ------
        y = jnp.dot(d_ref[...], wp_ref[...], preferred_element_type=f32) + bp
        y = y.reshape(th, Wq, cout_p)                        # free: Wq % 8 == 0

        # ---- shortcut + final ReLU ------------------------------------------
        if shortcut_mode == 1:
            # stride-1 identity shortcut recovered from the already-resident
            # input block (no extra HBM stream).  Extra lanes (ones channel /
            # channel padding) only touch channels the wrapper slices away.
            sc = jnp.concatenate(
                [xm_ref[0, 1:rows_main, 1:1 + Wq, 0:cout_p],
                 xh_ref[0, 0:1, 1:1 + Wq, 0:cout_p]], axis=0)
            y = y + sc.astype(f32)
        elif shortcut_mode == 2:
            y = y + sc_ref[0].astype(f32)
        o_ref[0] = jnp.maximum(y, 0.0).astype(o_ref.dtype)

    if shortcut_mode == 2:
        def kernel(xm, xh, w1, wd, bd, wp, bp, sc, o, t_scr, d_scr):
            body(xm, xh, w1, wd, bd, wp, bp, sc, o, t_scr, d_scr)
    else:
        def kernel(xm, xh, w1, wd, bd, wp, bp, o, t_scr, d_scr):
            body(xm, xh, w1, wd, bd, wp, bp, None, o, t_scr, d_scr)
    return kernel


def _vmem_bytes(th, stride, Wq, Wp_pad, cin_p, cexp_p, cout_p, streamed_sc):
    """Rough per-step VMEM footprint (double-buffered ins/outs + scratch)."""
    rows_main = th * stride
    rows_in = rows_main + 2
    b = rows_in * Wp_pad * cexp_p * 2                 # expanded activation (bf16 scratch)
    b += th * Wq * cexp_p * 2                         # depthwise output (bf16 scratch)
    b += 2 * rows_main * Wp_pad * cin_p * 2           # main input window (bf16, x2 buf)
    b += 2 * 2 * Wp_pad * cin_p * 2                   # halo window
    b += 2 * th * Wq * cout_p * 2                     # bf16 output
    if streamed_sc:
        b += 2 * th * Wq * cout_p * 2                 # bf16 shortcut stream
    b += 2 * ((cin_p * cexp_p + cexp_p * cout_p) * 2 + (11 * cexp_p + cout_p) * 4)
    b += th * Wq * cout_p * 4 + 4 * Wq * cexp_p * 4   # live f32 values
    return b


def _pick_tile_rows(desired, Ho, N, stride, Wq, Wp_pad, cin_p, cexp_p, cout_p,
                    streamed_sc):
    th = min(_round_up(max(desired, 2), 2), _round_up(Ho, 2))
    # VMEM budget (v7x has only 64 MiB physical VMEM).
    while th > 2 and _vmem_bytes(th, stride, Wq, Wp_pad, cin_p, cexp_p, cout_p,
                                 streamed_sc) > VMEM_BUDGET_BYTES:
        th -= 2
    # Keep enough grid steps to shard across 2 TensorCores (but not tiny tiles).
    while th > 4 and N * _cdiv(Ho, th) < MIN_GRID_STEPS:
        th -= 2
    return max(th, 2)


def fused_block(x_pad, w1, wd, bd, wp, bp, sc, *, th, stride, Ho_pad, Wq,
                shortcut_mode):
    N, Hp, Wp_pad, cin_p = x_pad.shape
    cexp_p = w1.shape[1]
    cout_p = wp.shape[1]
    rows_main = th * stride
    rows_in = rows_main + 2
    T = Ho_pad // th

    kernel = _make_block_kernel(th, stride, Wq, Wp_pad, shortcut_mode)

    in_specs = [
        # main row window (th*stride rows) of the padded, channel-augmented input
        pl.BlockSpec((1, rows_main, Wp_pad, cin_p), lambda n, i: (n, i, 0, 0)),
        # 2-row depthwise halo, fetched from the same array (block-aligned)
        pl.BlockSpec((1, 2, Wp_pad, cin_p),
                     lambda n, i: (n, (i + 1) * (rows_main // 2), 0, 0)),
        pl.BlockSpec((cin_p, cexp_p), lambda n, i: (0, 0)),
        pl.BlockSpec((9, 1, cexp_p), lambda n, i: (0, 0, 0)),
        pl.BlockSpec((1, cexp_p), lambda n, i: (0, 0)),
        pl.BlockSpec((cexp_p, cout_p), lambda n, i: (0, 0)),
        pl.BlockSpec((1, cout_p), lambda n, i: (0, 0)),
    ]
    args = [x_pad, x_pad, w1, wd, bd, wp, bp]
    if shortcut_mode == 2:
        in_specs.append(pl.BlockSpec((1, th, Wq, cout_p),
                                     lambda n, i: (n, i, 0, 0)))
        args.append(sc)

    steps = N * T
    flops = steps * (2 * rows_in * Wp_pad * cin_p * cexp_p          # expand
                     + 18 * th * Wq * cexp_p                        # depthwise
                     + 2 * th * Wq * cexp_p * cout_p)               # project
    bytes_accessed = (x_pad.size * 2
                      + N * Ho_pad * Wq * cout_p * 2
                      + (w1.size + wp.size) * 2
                      + (wd.size + bd.size + bp.size) * 4)
    if shortcut_mode == 2:
        bytes_accessed += sc.size * 2

    return pl.pallas_call(
        kernel,
        out_shape=jax.ShapeDtypeStruct((N, Ho_pad, Wq, cout_p), jnp.bfloat16),
        grid_spec=pltpu.PrefetchScalarGridSpec(
            num_scalar_prefetch=0,
            grid=(N, T),
            in_specs=in_specs,
            out_specs=pl.BlockSpec((1, th, Wq, cout_p),
                                   lambda n, i: (n, i, 0, 0)),
            scratch_shapes=[
                pltpu.VMEM((rows_in, Wp_pad, cexp_p), jnp.bfloat16),   # expanded act
                pltpu.VMEM((th * Wq, cexp_p), jnp.bfloat16),           # dw output
            ]),
        compiler_params=pltpu.CompilerParams(
            dimension_semantics=("parallel", "parallel"),
            vmem_limit_bytes=VMEM_LIMIT_BYTES),
        cost_estimate=pl.CostEstimate(flops=int(flops), transcendentals=0,
                                      bytes_accessed=int(bytes_accessed)),
    )(*args)


# ---------------------------------------------------------------------------
# The Block module (params generated deterministically, BN folded)
# ---------------------------------------------------------------------------
class BlockPallas:
    def __init__(self, in_channels, out_channels, expansion_rate, stride, key,
                 tile_rows=32):
        if isinstance(stride, (tuple, list)):
            stride = stride[0]
        self.stride = stride
        self.in_channels = in_channels
        self.out_channels = out_channels
        self.use_shortcut = (in_channels == out_channels)
        cexp = make_divisible(in_channels * expansion_rate, 8)
        self.cexp = cexp
        self.tile_rows = tile_rows

        ks = jax.random.split(key, 15)

        def bn(k0, k1, k2, k3, c):
            gamma = jax.random.uniform(k0, (c,), minval=0.5, maxval=1.5)
            beta = 0.1 * jax.random.normal(k1, (c,))
            mean = 0.1 * jax.random.normal(k2, (c,))
            var = jax.random.uniform(k3, (c,), minval=0.5, maxval=1.5)
            return gamma, beta, mean, var

        # expand 1x1 (out-channel last), depthwise 3x3 taps, project 1x1
        w1 = 0.3 * jax.random.normal(ks[0], (in_channels, cexp))
        w1, b1 = _fold_bn(w1, *bn(ks[1], ks[2], ks[3], ks[4], cexp))
        wd = 0.3 * jax.random.normal(ks[5], (9, cexp))
        wd, bd = _fold_bn(wd, *bn(ks[6], ks[7], ks[8], ks[9], cexp))
        wp = 0.3 * jax.random.normal(ks[10], (cexp, out_channels))
        wp, bp = _fold_bn(wp, *bn(ks[11], ks[12], ks[13], ks[14], out_channels))

        # raw folded params (f32) -- used by the pure-JAX reference
        self.p = dict(w1=w1.astype(jnp.float32), b1=b1.astype(jnp.float32),
                      wd=wd.astype(jnp.float32), bd=bd.astype(jnp.float32),
                      wp=wp.astype(jnp.float32), bp=bp.astype(jnp.float32))

        # lane-dense kernel params: channels zero-padded to multiples of 128;
        # the expand bias is folded into an extra "ones"-channel row of w1.
        self.cin_p = _round_up(in_channels + 1, LANE)
        self.cexp_p = _round_up(cexp, LANE)
        self.cout_p = _round_up(out_channels, LANE)
        w1k = jnp.zeros((self.cin_p, self.cexp_p), jnp.float32)
        w1k = w1k.at[:in_channels, :cexp].set(w1).at[in_channels, :cexp].set(b1)
        wdk = jnp.zeros((9, 1, self.cexp_p), jnp.float32).at[:, 0, :cexp].set(wd)
        bdk = jnp.zeros((1, self.cexp_p), jnp.float32).at[0, :cexp].set(bd)
        wpk = jnp.zeros((self.cexp_p, self.cout_p), jnp.float32)
        wpk = wpk.at[:cexp, :out_channels].set(wp)
        bpk = jnp.zeros((1, self.cout_p), jnp.float32).at[0, :out_channels].set(bp)
        self.pk = dict(w1=w1k.astype(jnp.bfloat16), wd=wdk, bd=bdk,
                       wp=wpk.astype(jnp.bfloat16), bp=bpk)

    def __call__(self, x_nchw):
        s = self.stride
        x = jnp.transpose(x_nchw, (0, 2, 3, 1)).astype(jnp.float32)   # NCHW -> NHWC
        N, H, W, Cin = x.shape
        Ho = (H - 1) // s + 1
        Wo = (W - 1) // s + 1
        Wq = _round_up(Wo, SUBLANE)                     # sublane-aligned compute width
        Wp_pad = _round_up(max((Wq - 1) * s + 3, W + 2), SUBLANE)

        if self.use_shortcut:
            shortcut_mode = 1 if s == 1 else 2
        else:
            shortcut_mode = 0
        if shortcut_mode == 1 and self.cout_p > self.cin_p:
            shortcut_mode = 2                           # defensive fallback

        th = _pick_tile_rows(self.tile_rows, Ho, N, s, Wq, Wp_pad,
                             self.cin_p, self.cexp_p, self.cout_p,
                             streamed_sc=(shortcut_mode == 2))
        Ho_pad = _round_up(Ho, th)
        Hp = Ho_pad * s + 2

        # channel-augmented (x, 1, 0...) + spatially zero-padded input, bf16
        ones = jnp.ones((N, H, W, 1), jnp.float32)
        x_aug = jnp.concatenate([x, ones], axis=-1)
        x_pad = jnp.pad(
            x_aug,
            ((0, 0), (1, Hp - H - 1), (1, Wp_pad - W - 1),
             (0, self.cin_p - Cin - 1)),
        ).astype(jnp.bfloat16)

        sc = None
        if shortcut_mode == 2:
            if s == 1:
                sc = x
            else:
                # AvgPool2d(kernel=3, stride=s, padding=1), count_include_pad=True
                sc = lax.reduce_window(x, 0.0, lax.add, (1, 3, 3, 1),
                                       (1, s, s, 1),
                                       ((0, 0), (1, 1), (1, 1), (0, 0))) / 9.0
            sc = jnp.pad(sc, ((0, 0), (0, Ho_pad - Ho), (0, Wq - Wo),
                              (0, self.cout_p - self.out_channels))
                         ).astype(jnp.bfloat16)

        y = fused_block(x_pad, self.pk["w1"], self.pk["wd"], self.pk["bd"],
                        self.pk["wp"], self.pk["bp"], sc,
                        th=th, stride=s, Ho_pad=Ho_pad, Wq=Wq,
                        shortcut_mode=shortcut_mode)
        y = y[:, :Ho, :Wo, :self.out_channels].astype(jnp.float32)
        return jnp.transpose(y, (0, 3, 1, 2))                         # NHWC -> NCHW


# ---------------------------------------------------------------------------
# Pure-JAX reference (lax convolutions, NCHW).  bf16 rounding points mirror the
# kernel: bf16 MXU operands for the 1x1 convs (f32 accumulation), bf16 storage
# of the expanded activation, f32 depthwise math.
# ---------------------------------------------------------------------------
def ref_block(x, p, stride, use_shortcut, cexp):
    bf16, f32 = jnp.bfloat16, jnp.float32

    def conv(lhs, w, s=1, pad=0, groups=1, precision=None):
        return lax.conv_general_dilated(
            lhs, w, (s, s), [(pad, pad), (pad, pad)],
            dimension_numbers=("NCHW", "OIHW", "NCHW"),
            feature_group_count=groups, precision=precision,
            preferred_element_type=f32)

    w1 = jnp.transpose(p["w1"])[:, :, None, None]                     # (Cexp,Cin,1,1)
    b1 = p["b1"].astype(bf16).astype(f32)
    t = jax.nn.relu(conv(x.astype(bf16), w1.astype(bf16))
                    + b1[None, :, None, None])
    t = t.astype(bf16).astype(f32)            # kernel keeps expanded act in bf16 VMEM
    wd = jnp.transpose(p["wd"].reshape(3, 3, cexp), (2, 0, 1))[:, None]  # (Cexp,1,3,3)
    t = jax.nn.relu(conv(t, wd, stride, 1, groups=cexp,
                         precision=lax.Precision.HIGHEST)
                    + p["bd"][None, :, None, None])
    wp = jnp.transpose(p["wp"])[:, :, None, None]                     # (Cout,Cexp,1,1)
    y = conv(t.astype(bf16), wp.astype(bf16)) + p["bp"][None, :, None, None]
    if use_shortcut:
        if stride == 1:
            scr = x
        else:
            scr = lax.reduce_window(x, 0.0, lax.add, (1, 1, 3, 3),
                                    (1, 1, stride, stride),
                                    ((0, 0), (0, 0), (1, 1), (1, 1))) / 9.0
        y = y + scr
    return jax.nn.relu(y)


if __name__ == "__main__":
    N, Cin, H, W = 2, 4, 16, 16
    out_channels, expansion_rate, stride = 4, 4, 1

    key = jax.random.PRNGKey(0)
    kx, kp = jax.random.split(key)
    x = jax.random.normal(kx, (N, Cin, H, W), dtype=jnp.float32)   # NCHW, like PyTorch

    block = BlockPallas(Cin, out_channels, expansion_rate, stride, kp)
    fwd = jax.jit(block.__call__)
    y = jax.block_until_ready(fwd(x))

    y_ref = ref_block(x, block.p, stride, block.use_shortcut, block.cexp)
    assert y.shape == y_ref.shape == (N, out_channels, H, W)
    err = float(jnp.max(jnp.abs(y - y_ref)))
    # bf16 MXU operands / bf16 activations with f32 accumulation -> bf16 tolerance
    assert jnp.allclose(y, y_ref, rtol=2e-2, atol=2e-2), f"max err {err}"
    print("KERNEL_OK")
</pallas_src>

<mosaic_0001>
module attributes {stable_mosaic.version = 11 : i64} {
  func.func @kernel(%arg0: i32, %arg1: i32, %arg2: memref<1x4x24x128xbf16, #tpu.memory_space<vmem>>, %arg3: memref<1x2x24x128xbf16, #tpu.memory_space<vmem>>, %arg4: memref<128x128xbf16, #tpu.memory_space<vmem>>, %arg5: memref<9x1x128xf32, #tpu.memory_space<vmem>>, %arg6: memref<1x128xf32, #tpu.memory_space<vmem>>, %arg7: memref<128x128xbf16, #tpu.memory_space<vmem>>, %arg8: memref<1x128xf32, #tpu.memory_space<vmem>>, %arg9: memref<1x4x16x128xbf16, #tpu.memory_space<vmem>>, %arg10: memref<6x24x128xbf16, #tpu.memory_space<vmem>>, %arg11: memref<64x128xbf16, #tpu.memory_space<vmem>>) attributes {dimension_semantics = [#tpu.dimension_semantics<parallel>, #tpu.dimension_semantics<parallel>], iteration_bounds = array<i64: 2, 4>, scalar_prefetch = 0 : i64, scratch_operands = 2 : i64, tpu.core_type = #tpu.core_type<tc>, window_params = [{transform_indices = @transform_0, window_bounds = array<i64: 1, 4, 24, 128>}, {transform_indices = @transform_1, window_bounds = array<i64: 1, 2, 24, 128>}, {pipeline_mode = #tpu.pipeline_mode<synchronous>, transform_indices = @transform_2, window_bounds = array<i64: 128, 128>}, {pipeline_mode = #tpu.pipeline_mode<synchronous>, transform_indices = @transform_3, window_bounds = array<i64: 9, 1, 128>}, {pipeline_mode = #tpu.pipeline_mode<synchronous>, transform_indices = @transform_4, window_bounds = array<i64: 1, 128>}, {pipeline_mode = #tpu.pipeline_mode<synchronous>, transform_indices = @transform_5, window_bounds = array<i64: 128, 128>}, {pipeline_mode = #tpu.pipeline_mode<synchronous>, transform_indices = @transform_6, window_bounds = array<i64: 1, 128>}, {transform_indices = @transform_7, window_bounds = array<i64: 1, 4, 16, 128>}]} {
    %c0 = arith.constant 0 : index
    %c0_0 = arith.constant 0 : index
    %c0_1 = arith.constant 0 : index
    %c0_2 = arith.constant 0 : index
    %0 = vector.load %arg2[%c0, %c0_0, %c0_1, %c0_2] : memref<1x4x24x128xbf16, #tpu.memory_space<vmem>>, vector<1x4x24x128xbf16>
    %1 = vector.shape_cast %0 : vector<1x4x24x128xbf16> to vector<4x24x128xbf16>
    %2 = vector.shape_cast %1 : vector<4x24x128xbf16> to vector<96x128xbf16>
    %c0_3 = arith.constant 0 : index
    %c0_4 = arith.constant 0 : index
    %c0_5 = arith.constant 0 : index
    %c0_6 = arith.constant 0 : index
    %3 = vector.load %arg3[%c0_3, %c0_4, %c0_5, %c0_6] : memref<1x2x24x128xbf16, #tpu.memory_space<vmem>>, vector<1x2x24x128xbf16>
    %4 = vector.shape_cast %3 : vector<1x2x24x128xbf16> to vector<2x24x128xbf16>
    %5 = vector.shape_cast %4 : vector<2x24x128xbf16> to vector<48x128xbf16>
    %c0_7 = arith.constant 0 : index
    %c0_8 = arith.constant 0 : index
    %6 = vector.load %arg4[%c0_7, %c0_8] : memref<128x128xbf16, #tpu.memory_space<vmem>>, vector<128x128xbf16>
    %cst = arith.constant dense<0.000000e+00> : vector<96x128xf32>
    %7 = tpu.matmul %2, %6, %cst {dimension_numbers = #tpu.dot_dimension_numbers<[1], [0], [0], [1], [0, 0, 1, 1], [], []>} : vector<96x128xbf16>, vector<128x128xbf16>, vector<96x128xf32> -> vector<96x128xf32>
    %cst_9 = arith.constant 0.000000e+00 : f32
    %8 = vector.broadcast %cst_9 : f32 to vector<96x128xf32>
    %9 = arith.maximumf %7, %8 : vector<96x128xf32>
    %10 = vector.shape_cast %9 : vector<96x128xf32> to vector<4x24x128xf32>
    %11 = arith.truncf %10 : vector<4x24x128xf32> to vector<4x24x128xbf16>
    %c0_10 = arith.constant 0 : index
    %c0_11 = arith.constant 0 : index
    %c0_12 = arith.constant 0 : index
    %12 = vector.load %arg10[%c0_10, %c0_11, %c0_12] : memref<6x24x128xbf16, #tpu.memory_space<vmem>>, vector<4x24x128xbf16>
    tpu.vector_store %arg10[%c0_10, %c0_11, %c0_12], %11 {strides = array<i32>} : memref<6x24x128xbf16, #tpu.memory_space<vmem>>, vector<4x24x128xbf16>,
    %c0_13 = arith.constant 0 : index
    %c0_14 = arith.constant 0 : index
    %13 = vector.load %arg4[%c0_13, %c0_14] : memref<128x128xbf16, #tpu.memory_space<vmem>>, vector<128x128xbf16>
    %cst_15 = arith.constant dense<0.000000e+00> : vector<48x128xf32>
    %14 = tpu.matmul %5, %13, %cst_15 {dimension_numbers = #tpu.dot_dimension_numbers<[1], [0], [0], [1], [0, 0, 1, 1], [], []>} : vector<48x128xbf16>, vector<128x128xbf16>, vector<48x128xf32> -> vector<48x128xf32>
    %cst_16 = arith.constant 0.000000e+00 : f32
    %15 = vector.broadcast %cst_16 : f32 to vector<48x128xf32>
    %16 = arith.maximumf %14, %15 : vector<48x128xf32>
    %17 = vector.shape_cast %16 : vector<48x128xf32> to vector<2x24x128xf32>
    %18 = arith.truncf %17 : vector<2x24x128xf32> to vector<2x24x128xbf16>
    %c4 = arith.constant 4 : index
    %c0_17 = arith.constant 0 : index
    %c0_18 = arith.constant 0 : index
    %19 = vector.load %arg10[%c4, %c0_17, %c0_18] : memref<6x24x128xbf16, #tpu.memory_space<vmem>>, vector<2x24x128xbf16>
    tpu.vector_store %arg10[%c4, %c0_17, %c0_18], %18 {strides = array<i32>} : memref<6x24x128xbf16, #tpu.memory_space<vmem>>, vector<2x24x128xbf16>,
    %c0_19 = arith.constant 0 : index
    %c0_20 = arith.constant 0 : index
    %c0_21 = arith.constant 0 : index
    %20 = vector.load %arg5[%c0_19, %c0_20, %c0_21] : memref<9x1x128xf32, #tpu.memory_space<vmem>>, vector<9x1x128xf32>
    %c0_22 = arith.constant 0 : index
    %c0_23 = arith.constant 0 : index
    %21 = vector.load %arg6[%c0_22, %c0_23] : memref<1x128xf32, #tpu.memory_space<vmem>>, vector<1x128xf32>
    %c0_24 = arith.constant 0 : index
    %c0_25 = arith.constant 0 : index
    %22 = vector.load %arg8[%c0_24, %c0_25] : memref<1x128xf32, #tpu.memory_space<vmem>>, vector<1x128xf32>
    %c0_26 = arith.constant 0 : index
    %c0_27 = arith.constant 0 : index
    %c0_28 = arith.constant 0 : index
    %23 = vector.load %arg10[%c0_26, %c0_27, %c0_28] : memref<6x24x128xbf16, #tpu.memory_space<vmem>>, vector<1x24x128xbf16>
    %24 = vector.shape_cast %23 : vector<1x24x128xbf16> to vector<24x128xbf16>
    %25 = arith.extf %24 : vector<24x128xbf16> to vector<24x128xf32>
    %26 = vector.extract_strided_slice %25 {offsets = [0, 0], sizes = [16, 128], strides = [1, 1]} : vector<24x128xf32> to vector<16x128xf32>
    %27 = vector.extract_strided_slice %20 {offsets = [0, 0, 0], sizes = [1, 1, 128], strides = [1, 1, 1]} : vector<9x1x128xf32> to vector<1x1x128xf32>
    %28 = vector.shape_cast %27 : vector<1x1x128xf32> to vector<1x128xf32>
    %29 = vector.broadcast %28 : vector<1x128xf32> to vector<16x128xf32>
    %30 = arith.mulf %26, %29 : vector<16x128xf32>
    %31 = vector.extract_strided_slice %25 {offsets = [1, 0], sizes = [16, 128], strides = [1, 1]} : vector<24x128xf32> to vector<16x128xf32>
    %32 = vector.extract_strided_slice %20 {offsets = [1, 0, 0], sizes = [1, 1, 128], strides = [1, 1, 1]} : vector<9x1x128xf32> to vector<1x1x128xf32>
    %33 = vector.shape_cast %32 : vector<1x1x128xf32> to vector<1x128xf32>
    %34 = vector.broadcast %33 : vector<1x128xf32> to vector<16x128xf32>
    %35 = arith.mulf %31, %34 : vector<16x128xf32>
    %36 = arith.addf %30, %35 : vector<16x128xf32>
    %37 = vector.extract_strided_slice %25 {offsets = [2, 0], sizes = [16, 128], strides = [1, 1]} : vector<24x128xf32> to vector<16x128xf32>
    %38 = vector.extract_strided_slice %20 {offsets = [2, 0, 0], sizes = [1, 1, 128], strides = [1, 1, 1]} : vector<9x1x128xf32> to vector<1x1x128xf32>
    %39 = vector.shape_cast %38 : vector<1x1x128xf32> to vector<1x128xf32>
    %40 = vector.broadcast %39 : vector<1x128xf32> to vector<16x128xf32>
    %41 = arith.mulf %37, %40 : vector<16x128xf32>
    %42 = arith.addf %36, %41 : vector<16x128xf32>
    %c1 = arith.constant 1 : index
    %c0_29 = arith.constant 0 : index
    %c0_30 = arith.constant 0 : index
    %43 = vector.load %arg10[%c1, %c0_29, %c0_30] : memref<6x24x128xbf16, #tpu.memory_space<vmem>>, vector<1x24x128xbf16>
    %44 = vector.shape_cast %43 : vector<1x24x128xbf16> to vector<24x128xbf16>
    %45 = arith.extf %44 : vector<24x128xbf16> to vector<24x128xf32>
    %46 = vector.extract_strided_slice %45 {offsets = [0, 0], sizes = [16, 128], strides = [1, 1]} : vector<24x128xf32> to vector<16x128xf32>
    %47 = vector.extract_strided_slice %20 {offsets = [3, 0, 0], sizes = [1, 1, 128], strides = [1, 1, 1]} : vector<9x1x128xf32> to vector<1x1x128xf32>
    %48 = vector.shape_cast %47 : vector<1x1x128xf32> to vector<1x128xf32>
    %49 = vector.broadcast %48 : vector<1x128xf32> to vector<16x128xf32>
    %50 = arith.mulf %46, %49 : vector<16x128xf32>
    %51 = arith.addf %42, %50 : vector<16x128xf32>
    %52 = vector.extract_strided_slice %45 {offsets = [1, 0], sizes = [16, 128], strides = [1, 1]} : vector<24x128xf32> to vector<16x128xf32>
    %53 = vector.extract_strided_slice %20 {offsets = [4, 0, 0], sizes = [1, 1, 128], strides = [1, 1, 1]} : vector<9x1x128xf32> to vector<1x1x128xf32>
    %54 = vector.shape_cast %53 : vector<1x1x128xf32> to vector<1x128xf32>
    %55 = vector.broadcast %54 : vector<1x128xf32> to vector<16x128xf32>
    %56 = arith.mulf %52, %55 : vector<16x128xf32>
    %57 = arith.addf %51, %56 : vector<16x128xf32>
    %58 = vector.extract_strided_slice %45 {offsets = [2, 0], sizes = [16, 128], strides = [1, 1]} : vector<24x128xf32> to vector<16x128xf32>
    %59 = vector.extract_strided_slice %20 {offsets = [5, 0, 0], sizes = [1, 1, 128], strides = [1, 1, 1]} : vector<9x1x128xf32> to vector<1x1x128xf32>
    %60 = vector.shape_cast %59 : vector<1x1x128xf32> to vector<1x128xf32>
    %61 = vector.broadcast %60 : vector<1x128xf32> to vector<16x128xf32>
    %62 = arith.mulf %58, %61 : vector<16x128xf32>
    %63 = arith.addf %57, %62 : vector<16x128xf32>
    %c2 = arith.constant 2 : index
    %c0_31 = arith.constant 0 : index
    %c0_32 = arith.constant 0 : index
    %64 = vector.load %arg10[%c2, %c0_31, %c0_32] : memref<6x24x128xbf16, #tpu.memory_space<vmem>>, vector<1x24x128xbf16>
    %65 = vector.shape_cast %64 : vector<1x24x128xbf16> to vector<24x128xbf16>
    %66 = arith.extf %65 : vector<24x128xbf16> to vector<24x128xf32>
    %67 = vector.extract_strided_slice %66 {offsets = [0, 0], sizes = [16, 128], strides = [1, 1]} : vector<24x128xf32> to vector<16x128xf32>
    %68 = vector.extract_strided_slice %20 {offsets = [6, 0, 0], sizes = [1, 1, 128], strides = [1, 1, 1]} : vector<9x1x128xf32> to vector<1x1x128xf32>
    %69 = vector.shape_cast %68 : vector<1x1x128xf32> to vector<1x128xf32>
    %70 = vector.broadcast %69 : vector<1x128xf32> to vector<16x128xf32>
    %71 = arith.mulf %67, %70 : vector<16x128xf32>
    %72 = arith.addf %63, %71 : vector<16x128xf32>
    %73 = vector.extract_strided_slice %66 {offsets = [1, 0], sizes = [16, 128], strides = [1, 1]} : vector<24x128xf32> to vector<16x128xf32>
    %74 = vector.extract_strided_slice %20 {offsets = [7, 0, 0], sizes = [1, 1, 128], strides = [1, 1, 1]} : vector<9x1x128xf32> to vector<1x1x128xf32>
    %75 = vector.shape_cast %74 : vector<1x1x128xf32> to vector<1x128xf32>
    %76 = vector.broadcast %75 : vector<1x128xf32> to vector<16x128xf32>
    %77 = arith.mulf %73, %76 : vector<16x128xf32>
    %78 = arith.addf %72, %77 : vector<16x128xf32>
    %79 = vector.extract_strided_slice %66 {offsets = [2, 0], sizes = [16, 128], strides = [1, 1]} : vector<24x128xf32> to vector<16x128xf32>
    %80 = vector.extract_strided_slice %20 {offsets = [8, 0, 0], sizes = [1, 1, 128], strides = [1, 1, 1]} : vector<9x1x128xf32> to vector<1x1x128xf32>
    %81 = vector.shape_cast %80 : vector<1x1x128xf32> to vector<1x128xf32>
    %82 = vector.broadcast %81 : vector<1x128xf32> to vector<16x128xf32>
    %83 = arith.mulf %79, %82 : vector<16x128xf32>
    %84 = arith.addf %78, %83 : vector<16x128xf32>
    %85 = vector.broadcast %21 : vector<1x128xf32> to vector<16x128xf32>
    %86 = arith.addf %84, %85 : vector<16x128xf32>
    %cst_33 = arith.constant 0.000000e+00 : f32
    %87 = vector.broadcast %cst_33 : f32 to vector<16x128xf32>
    %88 = arith.maximumf %86, %87 : vector<16x128xf32>
    %89 = arith.truncf %88 : vector<16x128xf32> to vector<16x128xbf16>
    %c0_34 = arith.constant 0 : index
    %c0_35 = arith.constant 0 : index
    %90 = vector.load %arg11[%c0_34, %c0_35] : memref<64x128xbf16, #tpu.memory_space<vmem>>, vector<16x128xbf16>
    tpu.vector_store %arg11[%c0_34, %c0_35], %89 {strides = array<i32>} : memref<64x128xbf16, #tpu.memory_space<vmem>>, vector<16x128xbf16>,
    %c1_36 = arith.constant 1 : index
    %c0_37 = arith.constant 0 : index
    %c0_38 = arith.constant 0 : index
    %91 = vector.load %arg10[%c1_36, %c0_37, %c0_38] : memref<6x24x128xbf16, #tpu.memory_space<vmem>>, vector<1x24x128xbf16>
    %92 = vector.shape_cast %91 : vector<1x24x128xbf16> to vector<24x128xbf16>
    %93 = arith.extf %92 : vector<24x128xbf16> to vector<24x128xf32>
    %94 = vector.extract_strided_slice %93 {offsets = [0, 0], sizes = [16, 128], strides = [1, 1]} : vector<24x128xf32> to vector<16x128xf32>
    %95 = vector.extract_strided_slice %20 {offsets = [0, 0, 0], sizes = [1, 1, 128], strides = [1, 1, 1]} : vector<9x1x128xf32> to vector<1x1x128xf32>
    %96 = vector.shape_cast %95 : vector<1x1x128xf32> to vector<1x128xf32>
    %97 = vector.broadcast %96 : vector<1x128xf32> to vector<16x128xf32>
    %98 = arith.mulf %94, %97 : vector<16x128xf32>
    %99 = vector.extract_strided_slice %93 {offsets = [1, 0], sizes = [16, 128], strides = [1, 1]} : vector<24x128xf32> to vector<16x128xf32>
    %100 = vector.extract_strided_slice %20 {offsets = [1, 0, 0], sizes = [1, 1, 128], strides = [1, 1, 1]} : vector<9x1x128xf32> to vector<1x1x128xf32>
    %101 = vector.shape_cast %100 : vector<1x1x128xf32> to vector<1x128xf32>
    %102 = vector.broadcast %101 : vector<1x128xf32> to vector<16x128xf32>
    %103 = arith.mulf %99, %102 : vector<16x128xf32>
    %104 = arith.addf %98, %103 : vector<16x128xf32>
    %105 = vector.extract_strided_slice %93 {offsets = [2, 0], sizes = [16, 128], strides = [1, 1]} : vector<24x128xf32> to vector<16x128xf32>
    %106 = vector.extract_strided_slice %20 {offsets = [2, 0, 0], sizes = [1, 1, 128], strides = [1, 1, 1]} : vector<9x1x128xf32> to vector<1x1x128xf32>
    %107 = vector.shape_cast %106 : vector<1x1x128xf32> to vector<1x128xf32>
    %108 = vector.broadcast %107 : vector<1x128xf32> to vector<16x128xf32>
    %109 = arith.mulf %105, %108 : vector<16x128xf32>
    %110 = arith.addf %104, %109 : vector<16x128xf32>
    %c2_39 = arith.constant 2 : index
    %c0_40 = arith.constant 0 : index
    %c0_41 = arith.constant 0 : index
    %111 = vector.load %arg10[%c2_39, %c0_40, %c0_41] : memref<6x24x128xbf16, #tpu.memory_space<vmem>>, vector<1x24x128xbf16>
    %112 = vector.shape_cast %111 : vector<1x24x128xbf16> to vector<24x128xbf16>
    %113 = arith.extf %112 : vector<24x128xbf16> to vector<24x128xf32>
    %114 = vector.extract_strided_slice %113 {offsets = [0, 0], sizes = [16, 128], strides = [1, 1]} : vector<24x128xf32> to vector<16x128xf32>
    %115 = vector.extract_strided_slice %20 {offsets = [3, 0, 0], sizes = [1, 1, 128], strides = [1, 1, 1]} : vector<9x1x128xf32> to vector<1x1x128xf32>
    %116 = vector.shape_cast %115 : vector<1x1x128xf32> to vector<1x128xf32>
    %117 = vector.broadcast %116 : vector<1x128xf32> to vector<16x128xf32>
    %118 = arith.mulf %114, %117 : vector<16x128xf32>
    %119 = arith.addf %110, %118 : vector<16x128xf32>
    %120 = vector.extract_strided_slice %113 {offsets = [1, 0], sizes = [16, 128], strides = [1, 1]} : vector<24x128xf32> to vector<16x128xf32>
    %121 = vector.extract_strided_slice %20 {offsets = [4, 0, 0], sizes = [1, 1, 128], strides = [1, 1, 1]} : vector<9x1x128xf32> to vector<1x1x128xf32>
    %122 = vector.shape_cast %121 : vector<1x1x128xf32> to vector<1x128xf32>
    %123 = vector.broadcast %122 : vector<1x128xf32> to vector<16x128xf32>
    %124 = arith.mulf %120, %123 : vector<16x128xf32>
    %125 = arith.addf %119, %124 : vector<16x128xf32>
    %126 = vector.extract_strided_slice %113 {offsets = [2, 0], sizes = [16, 128], strides = [1, 1]} : vector<24x128xf32> to vector<16x128xf32>
    %127 = vector.extract_strided_slice %20 {offsets = [5, 0, 0], sizes = [1, 1, 128], strides = [1, 1, 1]} : vector<9x1x128xf32> to vector<1x1x128xf32>
    %128 = vector.shape_cast %127 : vector<1x1x128xf32> to vector<1x128xf32>
    %129 = vector.broadcast %128 : vector<1x128xf32> to vector<16x128xf32>
    %130 = arith.mulf %126, %129 : vector<16x128xf32>
    %131 = arith.addf %125, %130 : vector<16x128xf32>
    %c3 = arith.constant 3 : index
    %c0_42 = arith.constant 0 : index
    %c0_43 = arith.constant 0 : index
    %132 = vector.load %arg10[%c3, %c0_42, %c0_43] : memref<6x24x128xbf16, #tpu.memory_space<vmem>>, vector<1x24x128xbf16>
    %133 = vector.shape_cast %132 : vector<1x24x128xbf16> to vector<24x128xbf16>
    %134 = arith.extf %133 : vector<24x128xbf16> to vector<24x128xf32>
    %135 = vector.extract_strided_slice %134 {offsets = [0, 0], sizes = [16, 128], strides = [1, 1]} : vector<24x128xf32> to vector<16x128xf32>
    %136 = vector.extract_strided_slice %20 {offsets = [6, 0, 0], sizes = [1, 1, 128], strides = [1, 1, 1]} : vector<9x1x128xf32> to vector<1x1x128xf32>
    %137 = vector.shape_cast %136 : vector<1x1x128xf32> to vector<1x128xf32>
    %138 = vector.broadcast %137 : vector<1x128xf32> to vector<16x128xf32>
    %139 = arith.mulf %135, %138 : vector<16x128xf32>
    %140 = arith.addf %131, %139 : vector<16x128xf32>
    %141 = vector.extract_strided_slice %134 {offsets = [1, 0], sizes = [16, 128], strides = [1, 1]} : vector<24x128xf32> to vector<16x128xf32>
    %142 = vector.extract_strided_slice %20 {offsets = [7, 0, 0], sizes = [1, 1, 128], strides = [1, 1, 1]} : vector<9x1x128xf32> to vector<1x1x128xf32>
    %143 = vector.shape_cast %142 : vector<1x1x128xf32> to vector<1x128xf32>
    %144 = vector.broadcast %143 : vector<1x128xf32> to vector<16x128xf32>
    %145 = arith.mulf %141, %144 : vector<16x128xf32>
    %146 = arith.addf %140, %145 : vector<16x128xf32>
    %147 = vector.extract_strided_slice %134 {offsets = [2, 0], sizes = [16, 128], strides = [1, 1]} : vector<24x128xf32> to vector<16x128xf32>
    %148 = vector.extract_strided_slice %20 {offsets = [8, 0, 0], sizes = [1, 1, 128], strides = [1, 1, 1]} : vector<9x1x128xf32> to vector<1x1x128xf32>
    %149 = vector.shape_cast %148 : vector<1x1x128xf32> to vector<1x128xf32>
    %150 = vector.broadcast %149 : vector<1x128xf32> to vector<16x128xf32>
    %151 = arith.mulf %147, %150 : vector<16x128xf32>
    %152 = arith.addf %146, %151 : vector<16x128xf32>
    %153 = vector.broadcast %21 : vector<1x128xf32> to vector<16x128xf32>
    %154 = arith.addf %152, %153 : vector<16x128xf32>
    %cst_44 = arith.constant 0.000000e+00 : f32
    %155 = vector.broadcast %cst_44 : f32 to vector<16x128xf32>
    %156 = arith.maximumf %154, %155 : vector<16x128xf32>
    %157 = arith.truncf %156 : vector<16x128xf32> to vector<16x128xbf16>
    %c16 = arith.constant 16 : index
    %c0_45 = arith.constant 0 : index
    %158 = vector.load %arg11[%c16, %c0_45] : memref<64x128xbf16, #tpu.memory_space<vmem>>, vector<16x128xbf16>
    tpu.vector_store %arg11[%c16, %c0_45], %157 {strides = array<i32>} : memref<64x128xbf16, #tpu.memory_space<vmem>>, vector<16x128xbf16>,
    %c2_46 = arith.constant 2 : index
    %c0_47 = arith.constant 0 : index
    %c0_48 = arith.constant 0 : index
    %159 = vector.load %arg10[%c2_46, %c0_47, %c0_48] : memref<6x24x128xbf16, #tpu.memory_space<vmem>>, vector<1x24x128xbf16>
    %160 = vector.shape_cast %159 : vector<1x24x128xbf16> to vector<24x128xbf16>
    %161 = arith.extf %160 : vector<24x128xbf16> to vector<24x128xf32>
    %162 = vector.extract_strided_slice %161 {offsets = [0, 0], sizes = [16, 128], strides = [1, 1]} : vector<24x128xf32> to vector<16x128xf32>
    %163 = vector.extract_strided_slice %20 {offsets = [0, 0, 0], sizes = [1, 1, 128], strides = [1, 1, 1]} : vector<9x1x128xf32> to vector<1x1x128xf32>
    %164 = vector.shape_cast %163 : vector<1x1x128xf32> to vector<1x128xf32>
    %165 = vector.broadcast %164 : vector<1x128xf32> to vector<16x128xf32>
    %166 = arith.mulf %162, %165 : vector<16x128xf32>
    %167 = vector.extract_strided_slice %161 {offsets = [1, 0], sizes = [16, 128], strides = [1, 1]} : vector<24x128xf32> to vector<16x128xf32>
    %168 = vector.extract_strided_slice %20 {offsets = [1, 0, 0], sizes = [1, 1, 128], strides = [1, 1, 1]} : vector<9x1x128xf32> to vector<1x1x128xf32>
    %169 = vector.shape_cast %168 : vector<1x1x128xf32> to vector<1x128xf32>
    %170 = vector.broadcast %169 : vector<1x128xf32> to vector<16x128xf32>
    %171 = arith.mulf %167, %170 : vector<16x128xf32>
    %172 = arith.addf %166, %171 : vector<16x128xf32>
    %173 = vector.extract_strided_slice %161 {offsets = [2, 0], sizes = [16, 128], strides = [1, 1]} : vector<24x128xf32> to vector<16x128xf32>
    %174 = vector.extract_strided_slice %20 {offsets = [2, 0, 0], sizes = [1, 1, 128], strides = [1, 1, 1]} : vector<9x1x128xf32> to vector<1x1x128xf32>
    %175 = vector.shape_cast %174 : vector<1x1x128xf32> to vector<1x128xf32>
    %176 = vector.broadcast %175 : vector<1x128xf32> to vector<16x128xf32>
    %177 = arith.mulf %173, %176 : vector<16x128xf32>
    %178 = arith.addf %172, %177 : vector<16x128xf32>
    %c3_49 = arith.constant 3 : index
    %c0_50 = arith.constant 0 : index
    %c0_51 = arith.constant 0 : index
    %179 = vector.load %arg10[%c3_49, %c0_50, %c0_51] : memref<6x24x128xbf16, #tpu.memory_space<vmem>>, vector<1x24x128xbf16>
    %180 = vector.shape_cast %179 : vector<1x24x128xbf16> to vector<24x128xbf16>
    %181 = arith.extf %180 : vector<24x128xbf16> to vector<24x128xf32>
    %182 = vector.extract_strided_slice %181 {offsets = [0, 0], sizes = [16, 128], strides = [1, 1]} : vector<24x128xf32> to vector<16x128xf32>
    %183 = vector.extract_strided_slice %20 {offsets = [3, 0, 0], sizes = [1, 1, 128], strides = [1, 1, 1]} : vector<9x1x128xf32> to vector<1x1x128xf32>
    %184 = vector.shape_cast %183 : vector<1x1x128xf32> to vector<1x128xf32>
    %185 = vector.broadcast %184 : vector<1x128xf32> to vector<16x128xf32>
    %186 = arith.mulf %182, %185 : vector<16x128xf32>
    %187 = arith.addf %178, %186 : vector<16x128xf32>
    %188 = vector.extract_strided_slice %181 {offsets = [1, 0], sizes = [16, 128], strides = [1, 1]} : vector<24x128xf32> to vector<16x128xf32>
    %189 = vector.extract_strided_slice %20 {offsets = [4, 0, 0], sizes = [1, 1, 128], strides = [1, 1, 1]} : vector<9x1x128xf32> to vector<1x1x128xf32>
    %190 = vector.shape_cast %189 : vector<1x1x128xf32> to vector<1x128xf32>
    %191 = vector.broadcast %190 : vector<1x128xf32> to vector<16x128xf32>
    %192 = arith.mulf %188, %191 : vector<16x128xf32>
    %193 = arith.addf %187, %192 : vector<16x128xf32>
    %194 = vector.extract_strided_slice %181 {offsets = [2, 0], sizes = [16, 128], strides = [1, 1]} : vector<24x128xf32> to vector<16x128xf32>
    %195 = vector.extract_strided_slice %20 {offsets = [5, 0, 0], sizes = [1, 1, 128], strides = [1, 1, 1]} : vector<9x1x128xf32> to vector<1x1x128xf32>
    %196 = vector.shape_cast %195 : vector<1x1x128xf32> to vector<1x128xf32>
    %197 = vector.broadcast %196 : vector<1x128xf32> to vector<16x128xf32>
    %198 = arith.mulf %194, %197 : vector<16x128xf32>
    %199 = arith.addf %193, %198 : vector<16x128xf32>
    %c4_52 = arith.constant 4 : index
    %c0_53 = arith.constant 0 : index
    %c0_54 = arith.constant 0 : index
    %200 = vector.load %arg10[%c4_52, %c0_53, %c0_54] : memref<6x24x128xbf16, #tpu.memory_space<vmem>>, vector<1x24x128xbf16>
    %201 = vector.shape_cast %200 : vector<1x24x128xbf16> to vector<24x128xbf16>
    %202 = arith.extf %201 : vector<24x128xbf16> to vector<24x128xf32>
    %203 = vector.extract_strided_slice %202 {offsets = [0, 0], sizes = [16, 128], strides = [1, 1]} : vector<24x128xf32> to vector<16x128xf32>
    %204 = vector.extract_strided_slice %20 {offsets = [6, 0, 0], sizes = [1, 1, 128], strides = [1, 1, 1]} : vector<9x1x128xf32> to vector<1x1x128xf32>
    %205 = vector.shape_cast %204 : vector<1x1x128xf32> to vector<1x128xf32>
    %206 = vector.broadcast %205 : vector<1x128xf32> to vector<16x128xf32>
    %207 = arith.mulf %203, %206 : vector<16x128xf32>
    %208 = arith.addf %199, %207 : vector<16x128xf32>
    %209 = vector.extract_strided_slice %202 {offsets = [1, 0], sizes = [16, 128], strides = [1, 1]} : vector<24x128xf32> to vector<16x128xf32>
    %210 = vector.extract_strided_slice %20 {offsets = [7, 0, 0], sizes = [1, 1, 128], strides = [1, 1, 1]} : vector<9x1x128xf32> to vector<1x1x128xf32>
    %211 = vector.shape_cast %210 : vector<1x1x128xf32> to vector<1x128xf32>
    %212 = vector.broadcast %211 : vector<1x128xf32> to vector<16x128xf32>
    %213 = arith.mulf %209, %212 : vector<16x128xf32>
    %214 = arith.addf %208, %213 : vector<16x128xf32>
    %215 = vector.extract_strided_slice %202 {offsets = [2, 0], sizes = [16, 128], strides = [1, 1]} : vector<24x128xf32> to vector<16x128xf32>
    %216 = vector.extract_strided_slice %20 {offsets = [8, 0, 0], sizes = [1, 1, 128], strides = [1, 1, 1]} : vector<9x1x128xf32> to vector<1x1x128xf32>
    %217 = vector.shape_cast %216 : vector<1x1x128xf32> to vector<1x128xf32>
    %218 = vector.broadcast %217 : vector<1x128xf32> to vector<16x128xf32>
    %219 = arith.mulf %215, %218 : vector<16x128xf32>
    %220 = arith.addf %214, %219 : vector<16x128xf32>
    %221 = vector.broadcast %21 : vector<1x128xf32> to vector<16x128xf32>
    %222 = arith.addf %220, %221 : vector<16x128xf32>
    %cst_55 = arith.constant 0.000000e+00 : f32
    %223 = vector.broadcast %cst_55 : f32 to vector<16x128xf32>
    %224 = arith.maximumf %222, %223 : vector<16x128xf32>
    %225 = arith.truncf %224 : vector<16x128xf32> to vector<16x128xbf16>
    %c32 = arith.constant 32 : index
    %c0_56 = arith.constant 0 : index
    %226 = vector.load %arg11[%c32, %c0_56] : memref<64x128xbf16, #tpu.memory_space<vmem>>, vector<16x128xbf16>
    tpu.vector_store %arg11[%c32, %c0_56], %225 {strides = array<i32>} : memref<64x128xbf16, #tpu.memory_space<vmem>>, vector<16x128xbf16>,
    %c3_57 = arith.constant 3 : index
    %c0_58 = arith.constant 0 : index
    %c0_59 = arith.constant 0 : index
    %227 = vector.load %arg10[%c3_57, %c0_58, %c0_59] : memref<6x24x128xbf16, #tpu.memory_space<vmem>>, vector<1x24x128xbf16>
    %228 = vector.shape_cast %227 : vector<1x24x128xbf16> to vector<24x128xbf16>
    %229 = arith.extf %228 : vector<24x128xbf16> to vector<24x128xf32>
    %230 = vector.extract_strided_slice %229 {offsets = [0, 0], sizes = [16, 128], strides = [1, 1]} : vector<24x128xf32> to vector<16x128xf32>
    %231 = vector.extract_strided_slice %20 {offsets = [0, 0, 0], sizes = [1, 1, 128], strides = [1, 1, 1]} : vector<9x1x128xf32> to vector<1x1x128xf32>
    %232 = vector.shape_cast %231 : vector<1x1x128xf32> to vector<1x128xf32>
    %233 = vector.broadcast %232 : vector<1x128xf32> to vector<16x128xf32>
    %234 = arith.mulf %230, %233 : vector<16x128xf32>
    %235 = vector.extract_strided_slice %229 {offsets = [1, 0], sizes = [16, 128], strides = [1, 1]} : vector<24x128xf32> to vector<16x128xf32>
    %236 = vector.extract_strided_slice %20 {offsets = [1, 0, 0], sizes = [1, 1, 128], strides = [1, 1, 1]} : vector<9x1x128xf32> to vector<1x1x128xf32>
    %237 = vector.shape_cast %236 : vector<1x1x128xf32> to vector<1x128xf32>
    %238 = vector.broadcast %237 : vector<1x128xf32> to vector<16x128xf32>
    %239 = arith.mulf %235, %238 : vector<16x128xf32>
    %240 = arith.addf %234, %239 : vector<16x128xf32>
    %241 = vector.extract_strided_slice %229 {offsets = [2, 0], sizes = [16, 128], strides = [1, 1]} : vector<24x128xf32> to vector<16x128xf32>
    %242 = vector.extract_strided_slice %20 {offsets = [2, 0, 0], sizes = [1, 1, 128], strides = [1, 1, 1]} : vector<9x1x128xf32> to vector<1x1x128xf32>
    %243 = vector.shape_cast %242 : vector<1x1x128xf32> to vector<1x128xf32>
    %244 = vector.broadcast %243 : vector<1x128xf32> to vector<16x128xf32>
    %245 = arith.mulf %241, %244 : vector<16x128xf32>
    %246 = arith.addf %240, %245 : vector<16x128xf32>
    %c4_60 = arith.constant 4 : index
    %c0_61 = arith.constant 0 : index
    %c0_62 = arith.constant 0 : index
    %247 = vector.load %arg10[%c4_60, %c0_61, %c0_62] : memref<6x24x128xbf16, #tpu.memory_space<vmem>>, vector<1x24x128xbf16>
    %248 = vector.shape_cast %247 : vector<1x24x128xbf16> to vector<24x128xbf16>
    %249 = arith.extf %248 : vector<24x128xbf16> to vector<24x128xf32>
    %250 = vector.extract_strided_slice %249 {offsets = [0, 0], sizes = [16, 128], strides = [1, 1]} : vector<24x128xf32> to vector<16x128xf32>
    %251 = vector.extract_strided_slice %20 {offsets = [3, 0, 0], sizes = [1, 1, 128], strides = [1, 1, 1]} : vector<9x1x128xf32> to vector<1x1x128xf32>
    %252 = vector.shape_cast %251 : vector<1x1x128xf32> to vector<1x128xf32>
    %253 = vector.broadcast %252 : vector<1x128xf32> to vector<16x128xf32>
    %254 = arith.mulf %250, %253 : vector<16x128xf32>
    %255 = arith.addf %246, %254 : vector<16x128xf32>
    %256 = vector.extract_strided_slice %249 {offsets = [1, 0], sizes = [16, 128], strides = [1, 1]} : vector<24x128xf32> to vector<16x128xf32>
    %257 = vector.extract_strided_slice %20 {offsets = [4, 0, 0], sizes = [1, 1, 128], strides = [1, 1, 1]} : vector<9x1x128xf32> to vector<1x1x128xf32>
    %258 = vector.shape_cast %257 : vector<1x1x128xf32> to vector<1x128xf32>
    %259 = vector.broadcast %258 : vector<1x128xf32> to vector<16x128xf32>
    %260 = arith.mulf %256, %259 : vector<16x128xf32>
    %261 = arith.addf %255, %260 : vector<16x128xf32>
    %262 = vector.extract_strided_slice %249 {offsets = [2, 0], sizes = [16, 128], strides = [1, 1]} : vector<24x128xf32> to vector<16x128xf32>
    %263 = vector.extract_strided_slice %20 {offsets = [5, 0, 0], sizes = [1, 1, 128], strides = [1, 1, 1]} : vector<9x1x128xf32> to vector<1x1x128xf32>
    %264 = vector.shape_cast %263 : vector<1x1x128xf32> to vector<1x128xf32>
    %265 = vector.broadcast %264 : vector<1x128xf32> to vector<16x128xf32>
    %266 = arith.mulf %262, %265 : vector<16x128xf32>
    %267 = arith.addf %261, %266 : vector<16x128xf32>
    %c5 = arith.constant 5 : index
    %c0_63 = arith.constant 0 : index
    %c0_64 = arith.constant 0 : index
    %268 = vector.load %arg10[%c5, %c0_63, %c0_64] : memref<6x24x128xbf16, #tpu.memory_space<vmem>>, vector<1x24x128xbf16>
    %269 = vector.shape_cast %268 : vector<1x24x128xbf16> to vector<24x128xbf16>
    %270 = arith.extf %269 : vector<24x128xbf16> to vector<24x128xf32>
    %271 = vector.extract_strided_slice %270 {offsets = [0, 0], sizes = [16, 128], strides = [1, 1]} : vector<24x128xf32> to vector<16x128xf32>
    %272 = vector.extract_strided_slice %20 {offsets = [6, 0, 0], sizes = [1, 1, 128], strides = [1, 1, 1]} : vector<9x1x128xf32> to vector<1x1x128xf32>
    %273 = vector.shape_cast %272 : vector<1x1x128xf32> to vector<1x128xf32>
    %274 = vector.broadcast %273 : vector<1x128xf32> to vector<16x128xf32>
    %275 = arith.mulf %271, %274 : vector<16x128xf32>
    %276 = arith.addf %267, %275 : vector<16x128xf32>
    %277 = vector.extract_strided_slice %270 {offsets = [1, 0], sizes = [16, 128], strides = [1, 1]} : vector<24x128xf32> to vector<16x128xf32>
    %278 = vector.extract_strided_slice %20 {offsets = [7, 0, 0], sizes = [1, 1, 128], strides = [1, 1, 1]} : vector<9x1x128xf32> to vector<1x1x128xf32>
    %279 = vector.shape_cast %278 : vector<1x1x128xf32> to vector<1x128xf32>
    %280 = vector.broadcast %279 : vector<1x128xf32> to vector<16x128xf32>
    %281 = arith.mulf %277, %280 : vector<16x128xf32>
    %282 = arith.addf %276, %281 : vector<16x128xf32>
    %283 = vector.extract_strided_slice %270 {offsets = [2, 0], sizes = [16, 128], strides = [1, 1]} : vector<24x128xf32> to vector<16x128xf32>
    %284 = vector.extract_strided_slice %20 {offsets = [8, 0, 0], sizes = [1, 1, 128], strides = [1, 1, 1]} : vector<9x1x128xf32> to vector<1x1x128xf32>
    %285 = vector.shape_cast %284 : vector<1x1x128xf32> to vector<1x128xf32>
    %286 = vector.broadcast %285 : vector<1x128xf32> to vector<16x128xf32>
    %287 = arith.mulf %283, %286 : vector<16x128xf32>
    %288 = arith.addf %282, %287 : vector<16x128xf32>
    %289 = vector.broadcast %21 : vector<1x128xf32> to vector<16x128xf32>
    %290 = arith.addf %288, %289 : vector<16x128xf32>
    %cst_65 = arith.constant 0.000000e+00 : f32
    %291 = vector.broadcast %cst_65 : f32 to vector<16x128xf32>
    %292 = arith.maximumf %290, %291 : vector<16x128xf32>
    %293 = arith.truncf %292 : vector<16x128xf32> to vector<16x128xbf16>
    %c48 = arith.constant 48 : index
    %c0_66 = arith.constant 0 : index
    %294 = vector.load %arg11[%c48, %c0_66] : memref<64x128xbf16, #tpu.memory_space<vmem>>, vector<16x128xbf16>
    tpu.vector_store %arg11[%c48, %c0_66], %293 {strides = array<i32>} : memref<64x128xbf16, #tpu.memory_space<vmem>>, vector<16x128xbf16>,
    %c0_67 = arith.constant 0 : index
    %c0_68 = arith.constant 0 : index
    %295 = vector.load %arg11[%c0_67, %c0_68] : memref<64x128xbf16, #tpu.memory_space<vmem>>, vector<64x128xbf16>
    %c0_69 = arith.constant 0 : index
    %c0_70 = arith.constant 0 : index
    %296 = vector.load %arg7[%c0_69, %c0_70] : memref<128x128xbf16, #tpu.memory_space<vmem>>, vector<128x128xbf16>
    %cst_71 = arith.constant dense<0.000000e+00> : vector<64x128xf32>
    %297 = tpu.matmul %295, %296, %cst_71 {dimension_numbers = #tpu.dot_dimension_numbers<[1], [0], [0], [1], [0, 0, 1, 1], [], []>} : vector<64x128xbf16>, vector<128x128xbf16>, vector<64x128xf32> -> vector<64x128xf32>
    %298 = vector.broadcast %22 : vector<1x128xf32> to vector<64x128xf32>
    %299 = arith.addf %297, %298 : vector<64x128xf32>
    %300 = vector.shape_cast %299 : vector<64x128xf32> to vector<4x16x128xf32>
    %c0_72 = arith.constant 0 : index
    %c1_73 = arith.constant 1 : index
    %c1_74 = arith.constant 1 : index
    %c0_75 = arith.constant 0 : index
    %301 = vector.load %arg2[%c0_72, %c1_73, %c1_74, %c0_75] : memref<1x4x24x128xbf16, #tpu.memory_space<vmem>>, vector<1x3x16x128xbf16>
    %302 = vector.shape_cast %301 : vector<1x3x16x128xbf16> to vector<3x16x128xbf16>
    %c0_76 = arith.constant 0 : index
    %c0_77 = arith.constant 0 : index
    %c1_78 = arith.constant 1 : index
    %c0_79 = arith.constant 0 : index
    %303 = vector.load %arg3[%c0_76, %c0_77, %c1_78, %c0_79] : memref<1x2x24x128xbf16, #tpu.memory_space<vmem>>, vector<1x1x16x128xbf16>
    %304 = vector.shape_cast %303 : vector<1x1x16x128xbf16> to vector<1x16x128xbf16>
    %305 = tpu.concatenate %302, %304 in 0 : vector<3x16x128xbf16>, vector<1x16x128xbf16> -> vector<4x16x128xbf16>
    %306 = arith.extf %305 : vector<4x16x128xbf16> to vector<4x16x128xf32>
    %307 = arith.addf %300, %306 : vector<4x16x128xf32>
    %cst_80 = arith.constant 0.000000e+00 : f32
    %308 = vector.broadcast %cst_80 : f32 to vector<4x16x128xf32>
    %309 = arith.maximumf %307, %308 : vector<4x16x128xf32>
    %310 = arith.truncf %309 : vector<4x16x128xf32> to vector<4x16x128xbf16>
    %c0_81 = arith.constant 0 : index
    %c0_82 = arith.constant 0 : index
    %c0_83 = arith.constant 0 : index
    %c0_84 = arith.constant 0 : index
    %311 = vector.load %arg9[%c0_81, %c0_82, %c0_83, %c0_84] : memref<1x4x16x128xbf16, #tpu.memory_space<vmem>>, vector<1x4x16x128xbf16>
    %312 = vector.shape_cast %311 : vector<1x4x16x128xbf16> to vector<4x16x128xbf16>
    %313 = vector.shape_cast %310 : vector<4x16x128xbf16> to vector<1x4x16x128xbf16>
    tpu.vector_store %arg9[%c0_81, %c0_82, %c0_83, %c0_84], %313 {strides = array<i32>} : memref<1x4x16x128xbf16, #tpu.memory_space<vmem>>, vector<1x4x16x128xbf16>,
    return
  }
  func.func @transform_0(%arg0: i32, %arg1: i32) -> (i32, i32, i32, i32) {
    %c0_i32 = arith.constant 0 : i32
    %c0_i32_0 = arith.constant 0 : i32
    %c0_i32_1 = arith.constant 0 : i32
    return %arg0, %arg1, %c0_i32, %c0_i32_0 : i32, i32, i32, i32
  }
  func.func @transform_1(%arg0: i32, %arg1: i32) -> (i32, i32, i32, i32) {
    %c1_i32 = arith.constant 1 : i32
    %0 = arith.addi %arg1, %c1_i32 : i32
    %c2_i32 = arith.constant 2 : i32
    %1 = arith.muli %0, %c2_i32 : i32
    %c0_i32 = arith.constant 0 : i32
    %c0_i32_0 = arith.constant 0 : i32
    %c0_i32_1 = arith.constant 0 : i32
    return %arg0, %1, %c0_i32, %c0_i32_0 : i32, i32, i32, i32
  }
  func.func @transform_2(%arg0: i32, %arg1: i32) -> (i32, i32) {
    %c0_i32 = arith.constant 0 : i32
    %c0_i32_0 = arith.constant 0 : i32
    %c0_i32_1 = arith.constant 0 : i32
    return %c0_i32, %c0_i32_0 : i32, i32
  }
  func.func @transform_3(%arg0: i32, %arg1: i32) -> (i32, i32, i32) {
    %c0_i32 = arith.constant 0 : i32
    %c0_i32_0 = arith.constant 0 : i32
    %c0_i32_1 = arith.constant 0 : i32
    %c0_i32_2 = arith.constant 0 : i32
    return %c0_i32, %c0_i32_0, %c0_i32_1 : i32, i32, i32
  }
  func.func @transform_4(%arg0: i32, %arg1: i32) -> (i32, i32) {
    %c0_i32 = arith.constant 0 : i32
    %c0_i32_0 = arith.constant 0 : i32
    %c0_i32_1 = arith.constant 0 : i32
    return %c0_i32, %c0_i32_0 : i32, i32
  }
  func.func @transform_5(%arg0: i32, %arg1: i32) -> (i32, i32) {
    %c0_i32 = arith.constant 0 : i32
    %c0_i32_0 = arith.constant 0 : i32
    %c0_i32_1 = arith.constant 0 : i32
    return %c0_i32, %c0_i32_0 : i32, i32
  }
  func.func @transform_6(%arg0: i32, %arg1: i32) -> (i32, i32) {
    %c0_i32 = arith.constant 0 : i32
    %c0_i32_0 = arith.constant 0 : i32
    %c0_i32_1 = arith.constant 0 : i32
    return %c0_i32, %c0_i32_0 : i32, i32
  }
  func.func @transform_7(%arg0: i32, %arg1: i32) -> (i32, i32, i32, i32) {
    %c0_i32 = arith.constant 0 : i32
    %c0_i32_0 = arith.constant 0 : i32
    %c0_i32_1 = arith.constant 0 : i32
    return %arg0, %arg1, %c0_i32, %c0_i32_0 : i32, i32, i32, i32
  }
}

</mosaic_0001>

<bundles_post_ra>
// kernel: a_call__.1
= control target key start
LH: loop header
LB: loop body
LE: loop exit
PB: predicated region body
PF: predicated region fallthrough
CT: control target
= control target key end

     0   :  { %s2371_s24 = smov 0   ;;  %s2373_s25 = smov 0   ;;  %s2868_s0 = inlined_call_operand.vmem [shape: bf16[2,18,24,128], index: 0, kind: input, shape index: {}, may-alias: {0,1}]   ;;  %s2869_s1 = inlined_call_operand.vmem [shape: bf16[2,18,24,128], index: 1, kind: input, shape index: {}, may-alias: {0,1}]   ;;  %s2870_s2 = inlined_call_operand.vmem [shape: bf16[128,128], index: 2, kind: input, shape index: {}]   ;;  %s2871_s3 = inlined_call_operand.vmem [shape: f32[9,1,128], index: 3, kind: input, shape index: {}]   ;;  %s2872_s4 = inlined_call_operand.vmem [shape: f32[1,128], index: 4, kind: input, shape index: {}]   ;;  %s2873_s5 = inlined_call_operand.vmem [shape: bf16[128,128], index: 5, kind: input, shape index: {}]   ;;  %s2874_s6 = inlined_call_operand.vmem [shape: f32[1,128], index: 6, kind: input, shape index: {}]   ;;  %s2875_s7 = inlined_call_operand.vmem [shape: bf16[2,16,16,128], index: 7, kind: output, shape index: {}]  }
   0x1   :  { %s2375_s26 = smov 0   ;;  %s2377_s27 = smov 0  }
   0x2   :  { %s2379_s28 = smov 0  }
   0x3 LB: > { %s26_s29 = sadd.s32 1, %s2319_s26  ;;  %s29_s30 = sadd.s32 1, %s2323_s27  ;;  %s2327_s28 = sphi %s2379_s28, %s17_s28   ;;  %s2323_s27 = sphi %s2377_s27, %s2879_s27   ;;  %s2319_s26 = sphi %s2375_s26, %s2878_s26   ;;  %s2315_s25 = sphi %s2373_s25, %s2877_s25   ;;  %s2311_s24 = sphi %s2371_s24, %s2876_s24  }
   0x4   : > { %p27_p0 = scmp.ge.s32.totalorder %s26_s29, 4  ;;  %p1814_p1 = scmp.ge.s32.totalorder %s2327_s28, 1 }
   0x5   : > { %p295_p2 = scmp.lt.s32.totalorder %s2327_s28, 9 }
   0x6   : > { %s2881_s29 = smov (%p27_p0, %s26_s29), 0  ;;  %s2883_s30 = smov (!%p27_p0, %s29_s30), %s2323_s27 }
   0x7   : > { %p296_p3 = pnand %p1814_p1, %p295_p2  ;;  %p31_p4 = scmp.ge.s32.totalorder %s2883_s30, 2 }
   0x8   : > { %v2256_v0 = vld [vmem:[%s2870_s2] sm:$0xff] (!%p296_p3)   ;;  %v2257_v1 = vld [vmem:[%s2870_s2 + $0x8] sm:$0xff] (!%p296_p3)   ;;  %v2329_v2 = vmov (!%p296_p3), 0.0   ;;  %s2408_s12 = sshll.u32 (!%p296_p3), %s2311_s24, 2  ;;  %p360_p5 = scmp.lt.s32.totalorder (!%p296_p3), %s2315_s25, 1  ;;  %v2259_v4 = vld [vmem:[%s2870_s2 + $0x10] sm:$0xff] (!%p296_p3)  }
   0x9   : > { %s2885_s30 = smov (%p31_p4, %s2883_s30), 0  ;;  %299 = sbr.rel (%p296_p3) target bundleno = 579 (0x243), region = 48 }
   0xa   : > { %2143 = vmatprep.subr.bf16.mxu1 (!%p296_p3), %v2329_v2  ;;  %2115 = vmatprep.subr.bf16.mxu0 (!%p296_p3), %v2256_v0  ;;  %v2258_v3 = vld [vmem:[%s2870_s2] sm:$0xff] (!%p296_p3)   ;;  %p362_p6 = scmp.lt.s32.totalorder (!%p296_p3), %s2408_s12, 17  ;;  %v2260_v5 = vld [vmem:[%s2870_s2 + $0x8] sm:$0xff] (!%p296_p3)   ;;  %v2261_v6 = vld [vmem:[%s2870_s2 + $0x18] sm:$0xff] (!%p296_p3)   ;;  %vm2330_vm0 = vmmov (!%p296_p3), 0   ;;  %s2060_s10 = sadd.s32 (!%p296_p3), 4, %s2408_s12 }
   0xb   : > { %2116 = vmatpush3.bf16.msra.mxu0 (!%p296_p3), %v2256_v0  ;;  %2144 = vmatpush3.bf16.msra.mxu1 (!%p296_p3), %v2258_v3  ;;  %v2262_v7 = vld [vmem:[%s2870_s2 + $0x10] sm:$0xff] (!%p296_p3)   ;;  %v2263_v8 = vld [vmem:[%s2870_s2 + $0x20] sm:$0xff] (!%p296_p3)   ;;  %p380_p7 = scmp.lt.s32.totalorder (!%p296_p3), %s2060_s10, 17  ;;  %v2264_v9 = vld [vmem:[%s2870_s2 + $0x18] sm:$0xff] (!%p296_p3)   ;;  %vm892_vm1 = vcmask (!%p296_p3), 1046528   ;;  %vm914_vm2 = vcmask (!%p296_p3), 1045504  }
   0xc   : > { %2117 = vmatprep.subr.bf16.mxu0 (!%p296_p3), %v2257_v1  ;;  %2145 = vmatprep.subr.bf16.mxu1 (!%p296_p3), %v2329_v2  ;;  %v2265_v10 = vld [vmem:[%s2870_s2 + $0x28] sm:$0xff] (!%p296_p3)   ;;  %v2266_v12 = vld [vmem:[%s2870_s2 + $0x20] sm:$0xff] (!%p296_p3)   ;;  %v2267_v13 = vld [vmem:[%s2870_s2 + $0x30] sm:$0xff] (!%p296_p3)   ;;  %p393_p8 = scmp.lt.s32.totalorder (!%p296_p3), %s2408_s12, 15 }
   0xd   : > { %2159 = vmatprep.mubr.msk.bf16.mxu1 (!%p296_p3), %vm2330_vm0, %v2329_v2  ;;  %v2268_v14 = vld [vmem:[%s2870_s2 + $0x28] sm:$0xff] (!%p296_p3)   ;;  %v2269_v15 = vld [vmem:[%s2870_s2 + $0x38] sm:$0xff] (!%p296_p3)   ;;  %v2270_v16 = vld [vmem:[%s2870_s2 + $0x30] sm:$0xff] (!%p296_p3)  }
   0xe   : > { %v2273_v17 = vld [vmem:[%s2870_s2 + $0x38] sm:$0xff] (!%p296_p3)   ;;  %v2281_v26 = vld [vmem:[%s2873_s5] sm:$0xff] (!%p296_p3)   ;;  %v2282_v27 = vld [vmem:[%s2873_s5 + $0x8] sm:$0xff] (!%p296_p3)  }
   0xf   : > { %2118 = vmatpush3.bf16.msra.mxu0 (!%p296_p3), %v2257_v1  ;;  %2146 = vmatpush3.bf16.msra.mxu1 (!%p296_p3), %v2260_v5  ;;  %v2283_v28 = vld [vmem:[%s2873_s5 + $0x10] sm:$0xff] (!%p296_p3)   ;;  %v2284_v29 = vld [vmem:[%s2873_s5 + $0x18] sm:$0xff] (!%p296_p3)   ;;  %v2285_v30 = vld [vmem:[%s2873_s5 + $0x20] sm:$0xff] (!%p296_p3)  }
  0x10   : > { %s2887_s25 = smov (!%p360_p5, %s2315_s25), 1  ;;  %2119 = vmatprep.subr.bf16.mxu0 %v2259_v4  ;;  %2147 = vmatprep.subr.bf16.mxu1 %v2329_v2  ;;  %s2889_s10 = smov (!%p380_p7, %s2060_s10), 17  ;;  %v2286_v31 = vld [vmem:[%s2873_s5 + $0x28] sm:$0xff]   ;;  %v2287_v32 = vld [vmem:[%s2873_s5 + $0x30] sm:$0xff]   ;;  %v2288_v33 = vld [vmem:[%s2873_s5 + $0x38] sm:$0xff]  }
  0x11   : > { %s363_s19 = scalar_select %p362_p6, %s2408_s12, 17  ;;  %v2521_v51 = vld [vmem:[%s2871_s3] ss:$0 sm:$0xff]  ;;  %v2526_v53 = vld [vmem:[%s2871_s3 + $0x1] ss:$0 sm:$0xff] }
  0x12   : > { %s2212_s20 = smul.u32 54, %s2887_s25  ;;  %v2531_v54 = vld [vmem:[%s2871_s3 + $0x2] ss:$0 sm:$0xff]  ;;  %s2891_s12 = smov (!%p393_p8, %s2408_s12), 15 }
  0x13   : > { %s2211_s23 = smul.u32 3, %s363_s19  ;;  %2120 = vmatpush3.bf16.msra.mxu0 %v2259_v4  ;;  %2148 = vmatpush3.bf16.msra.mxu1 %v2262_v7  ;;  %v2544_v7 = vld [vmem:[%s2871_s3 + $0x6] ss:$0 sm:$0xff]  ;;  %s1821_s22 = sshll.u32 %s2891_s12, 1 }
  0x14   : > { %2121 = vmatprep.subr.bf16.mxu0 %v2261_v6  ;;  %2149 = vmatprep.subr.bf16.mxu1 %v2329_v2 }
  0x15   : > { %s366_s9 = sadd.s32 %s2212_s20, %s2211_s23  ;;  %s2213_s23 = smul.u32 3, %s2889_s10 }
  0x16   : > { %s1816_s11 = sshll.u32 %s366_s9, 2 }
  0x17   : > { %s2446_s19 = scalar_lea.vmem %s2868_s0, %s1816_s11  ;;  %2122 = vmatpush3.bf16.msra.mxu0 %v2261_v6  ;;  %2150 = vmatpush3.bf16.msra.mxu1 %v2264_v9  ;;  %s384_s9 = sadd.s32 %s2213_s23, %s2212_s20 }
  0x18   : > { %v2271_v11 = vld [vmem:[%s2446_s19] sm:$0xff]   ;;  %2123 = vmatprep.subr.bf16.mxu0 %v2263_v8  ;;  %2151 = vmatprep.subr.bf16.mxu1 %v2329_v2  ;;  %s1819_s11 = sshll.u32 %s384_s9, 2  ;;  %v2272_v18 = vld [vmem:[%s2446_s19 + $0x8] sm:$0xff]   ;;  %v2275_v20 = vld [vmem:[%s2446_s19 + $0x10] sm:$0xff]   ;;  %s1822_s23 = sshll.u32 %s2887_s25, 5 }
  0x19   : > { %2131 = vmatprep.mubr.bf16.mxu0 %v2271_v11  ;;  %s2465_s10 = scalar_lea.vmem %s2869_s1, %s1819_s11  ;;  %v2276_v21 = vld [vmem:[%s2446_s19 + $0x18] sm:$0xff]   ;;  %v2278_v23 = vld [vmem:[%s2446_s19 + $0x20] sm:$0xff]   ;;  %v2279_v24 = vld [vmem:[%s2446_s19 + $0x28] sm:$0xff]   ;;  %s397_s24 = sadd.s32 %s1822_s23, %s1821_s22 }
  0x1a   : > { %v2274_v19 = vld [vmem:[%s2465_s10] sm:$0xff]   ;;  %v2277_v22 = vld [vmem:[%s2465_s10 + $0x8] sm:$0xff]   ;;  %v2280_v25 = vld [vmem:[%s2465_s10 + $0x10] sm:$0xff]   ;;  %s1823_s25 = sshll.u32 %s397_s24, 2 }
  0x1b   : > { %2124 = vmatpush3.bf16.msra.mxu0 %v2263_v8  ;;  %2152 = vmatpush3.bf16.msra.mxu1 %v2266_v12  ;;  %s2839_s9 = scalar_lea.vmem %s2875_s7, %s1823_s25 }
  0x1c   : > { %2125 = vmatprep.subr.bf16.mxu0 %v2265_v10  ;;  %2153 = vmatprep.subr.bf16.mxu1 %v2329_v2 }
  0x1f   : > { %2126 = vmatpush3.bf16.msra.mxu0 %v2265_v10  ;;  %2154 = vmatpush3.bf16.msra.mxu1 %v2268_v14 }
  0x20   : > { %2127 = vmatprep.subr.bf16.mxu0 %v2267_v13  ;;  %2155 = vmatprep.subr.bf16.mxu1 %v2329_v2 }
  0x23   : > { %2128 = vmatpush3.bf16.msra.mxu0 %v2267_v13  ;;  %2156 = vmatpush3.bf16.msra.mxu1 %v2270_v16 }
  0x24   : > { %2129 = vmatprep.subr.bf16.mxu0 %v2269_v15  ;;  %2157 = vmatprep.subr.bf16.mxu1 %v2329_v2 }
  0x27   : > { %2130 = vmatpush3.bf16.msra.mxu0 %v2269_v15  ;;  %2158 = vmatpush3.bf16.msra.mxu1 %v2273_v17 }
  0x28   : > { %2171 = vmatprep.subr.bf16.mxu0 %v2281_v26  ;;  %2195 = vmatprep.subr.bf16.mxu1 %v2281_v26 }
  0x2a   : > { %2132 = vmatmul.mubr.bf16.vlgmr.msra.gmra.mrb[0].mxu0 %v2272_v18  ;;  %2160 = vmatmul.mubr.bf16.vlgmr.msra.gmra.mrb[0].mxu1 %v2274_v19 }
  0x2b   : > { %2135 = vmatprep.mubr.bf16.mxu0 %v2275_v20  ;;  %2163 = vmatprep.mubr.msk.bf16.mxu1 %vm2330_vm0, %v2329_v2 }
  0x2c   : > { %2172 = vmatpush3.bf16.msra.mxu0 %v2281_v26  ;;  %2203 = vmatpush3.bf16.msra.mxu1 %v2281_v26  ;;  %v2563_v26 = vld [vmem:[%s2871_s3 + $0x3] ss:$0 sm:$0xff] }
  0x2d   : > { %2173 = vmatprep.subr.bf16.mxu0 %v2282_v27  ;;  %2196 = vmatprep.subr.bf16.mxu1 %v2282_v27 }
  0x30   : > { %2174 = vmatpush3.bf16.msra.mxu0 %v2282_v27  ;;  %2204 = vmatpush3.bf16.msra.mxu1 %v2282_v27 }
  0x31   : > { %2175 = vmatprep.subr.bf16.mxu0 %v2283_v28  ;;  %2197 = vmatprep.subr.bf16.mxu1 %v2283_v28 }
  0x32   : > { %2136 = vmatmul.mubr.bf16.gmra.mrb[4].mxu0 %v2276_v21  ;;  %2164 = vmatmul.mubr.bf16.gmra.mrb[4].mxu1 %v2277_v22 }
  0x33   : > { %2139 = vmatprep.mubr.bf16.mxu0 %v2278_v23  ;;  %2167 = vmatprep.mubr.msk.bf16.mxu1 %vm2330_vm0, %v2329_v2 }
  0x34   : > { %2176 = vmatpush3.bf16.msra.mxu0 %v2283_v28  ;;  %2205 = vmatpush3.bf16.msra.mxu1 %v2283_v28 }
  0x35   : > { %2177 = vmatprep.subr.bf16.mxu0 %v2284_v29  ;;  %2198 = vmatprep.subr.bf16.mxu1 %v2284_v29 }
  0x38   : > { %2178 = vmatpush3.bf16.msra.mxu0 %v2284_v29  ;;  %2206 = vmatpush3.bf16.msra.mxu1 %v2284_v29 }
  0x39   : > { %2179 = vmatprep.subr.bf16.mxu0 %v2285_v30  ;;  %2199 = vmatprep.subr.bf16.mxu1 %v2285_v30 }
  0x3a   : > { %2140 = vmatmul.mubr.bf16.gmra.mrb[8].mxu0 %v2279_v24  ;;  %2168 = vmatmul.mubr.bf16.gmra.mrb[8].mxu1 %v2280_v25 }
  0x3c   : > { %2180 = vmatpush3.bf16.msra.mxu0 %v2285_v30  ;;  %2207 = vmatpush3.bf16.msra.mxu1 %v2285_v30 }
  0x3d   : > { %2181 = vmatprep.subr.bf16.mxu0 %v2286_v31  ;;  %2200 = vmatprep.subr.bf16.mxu1 %v2286_v31 }
  0x40   : > { %2182 = vmatpush3.bf16.msra.mxu0 %v2286_v31  ;;  %2208 = vmatpush3.bf16.msra.mxu1 %v2286_v31 }
  0x41   : > { %2183 = vmatprep.subr.bf16.mxu0 %v2287_v32  ;;  %2201 = vmatprep.subr.bf16.mxu1 %v2287_v32 }
  0x44   : > { %2184 = vmatpush3.bf16.msra.mxu0 %v2287_v32  ;;  %2209 = vmatpush3.bf16.msra.mxu1 %v2287_v32 }
  0x45   : > { %2185 = vmatprep.subr.bf16.mxu0 %v2288_v33  ;;  %2202 = vmatprep.subr.bf16.mxu1 %v2288_v33 }
  0x48   : > { %2186 = vmatpush3.bf16.msra.mxu0 %v2288_v33  ;;  %2210 = vmatpush3.bf16.msra.mxu1 %v2288_v33  ;;  %v2575_v33 = vld [vmem:[%s2871_s3 + $0x4] ss:$0 sm:$0xff] }
  0xfd   : > { %v2133_v34 = vpop.f32.mrb[0].mxu0  ;;  %v793_v36 = vpop.f32.mrb[0].mxu1 }
  0xfe   : > { %v554_v35 = vpop.f32.mrb[1].mxu0  ;;  %v816_v38 = vmax.f32 %v793_v36, 0.0  ;;  %v2161_v39 = vpop.f32.mrb[1].mxu1  ;;  %v603_v40 = vmax.f32 %v2133_v34, 0.0 }
  0xff   : > { %v2134_v37 = vpop.f32.mrb[2].mxu0  ;;  %v796_v43 = vpop.f32.mrb[2].mxu1  ;;  %v601_v44 = vmax.f32 %v554_v35, 0.0  ;;  %v2581_v39 = vld [vmem:[%s2871_s3 + $0x5] ss:$0 sm:$0xff] }
 0x100   : > { %v604_v41 = vmax.f32 %v2134_v37, 0.0  ;;  %v557_v42 = vpop.f32.mrb[3].mxu0  ;;  %v817_v46 = vmax.f32 %v796_v43, 0.0  ;;  %v2162_v47 = vpop.f32.mrb[3].mxu1 }
 0x101   : > { %v602_v45 = vmax.f32 %v557_v42, 0.0 }
 0x102   : > { %v1946_v48 = vpack.c.bf16 %v604_v41, %v603_v40  ;;  %v1971_v50 = vpack.c.bf16 %v817_v46, %v816_v38 }
 0x103   : > { %v1941_v49 = vpack.c.bf16 %v602_v45, %v601_v44 }
 0x104   : > { %2061 = vst [vmem:[#allocation2 + $0x8] sm:$0xff] %v1946_v48   ;;  %v2533_v57 = vunpack.c.l.bf16 %v1971_v50  ;;  %v2535_v61 = vunpack.c.h.bf16 %v1971_v50 }
 0x105   : > { %v2137_v52 = vpop.f32.mrb[4].mxu0  ;;  %v1985_v55 = vunpack.c.l.bf16 %v1941_v49  ;;  %v1986_v56 = vunpack.c.h.bf16 %v1941_v49  ;;  %v801_v60 = vpop.f32.mrb[4].mxu1 }
 0x106   : > { %v607_v58 = vmax.f32 %v2137_v52, 0.0  ;;  %v570_v59 = vpop.f32.mrb[5].mxu0  ;;  %v818_v0 = vmax.f32 %v801_v60, 0.0  ;;  %v2165_v1 = vpop.f32.mrb[5].mxu1  ;;  %v2552_v15 = vmul.f32 %v2533_v57, %v2544_v7  ;;  %v2556_v24 = vmul.f32 %v2535_v61, %v2544_v7 }
 0x107   : > { %v605_v62 = vmax.f32 %v570_v59, 0.0  ;;  %v2138_v63 = vpop.f32.mrb[6].mxu0  ;;  %v878_v2 = vmul.f32 %v1985_v55, %v2521_v51  ;;  %v2539_v3 = vmul.f32 %v1986_v56, %v2521_v51  ;;  %v804_v6 = vpop.f32.mrb[6].mxu1  ;;  %v886_v8 = vmul.f32 %v1985_v55, %v2526_v53 }
 0x108   : > { %v608_v4 = vmax.f32 %v2138_v63, 0.0  ;;  %v573_v5 = vpop.f32.mrb[7].mxu0  ;;  %v887_v9 = vmul.f32 %v1986_v56, %v2526_v53  ;;  %v908_v10 = vmul.f32 %v1985_v55, %v2531_v54  ;;  %v819_v12 = vmax.f32 %v804_v6, 0.0  ;;  %v2166_v13 = vpop.f32.mrb[7].mxu1 }
 0x109   : > { %v606_v11 = vmax.f32 %v573_v5, 0.0  ;;  %v909_v14 = vmul.f32 %v1986_v56, %v2531_v54  ;;  %v893_v17 = vrot.slane %v886_v8, 1 }
 0x10a   : > { %v1956_v16 = vpack.c.bf16 %v608_v4, %v607_v58  ;;  %v894_v18 = vrot.slane %v887_v9, 1  ;;  %v915_v19 = vrot.slane %v908_v10, 2  ;;  %v1976_v22 = vpack.c.bf16 %v819_v12, %v818_v0  ;;  %v2602_v9 = vld [vmem:[%s2871_s3 + $0x7] ss:$0 sm:$0xff] }
 0x10b   : > { %v1054_v20 = vld [vmem:[#allocation2 + $0x8] sm:$0xff]   ;;  %v1951_v21 = vpack.c.bf16 %v606_v11, %v605_v62  ;;  %v916_v23 = vrot.slane %v909_v14, 2 }
 0x10c   : > { %v2558_v25 = vunpack.c.h.bf16 %v1054_v20  ;;  %v871_v27 = vunpack.c.l.bf16 %v1054_v20  ;;  %v895_v28 = vsel %vm892_vm1, %v893_v17, %v894_v18  ;;  %v2566_v29 = vunpack.c.l.bf16 %v1956_v16  ;;  %2066 = vst [vmem:[#allocation2 + $0x38] sm:$0xff] %v1976_v22  }
 0x10d   : > { %v2568_v30 = vunpack.c.l.bf16 %v1951_v21  ;;  %v2570_v31 = vunpack.c.h.bf16 %v1951_v21  ;;  %v2141_v32 = vpop.f32.mrb[8].mxu0  ;;  %v900_v34 = vadd.f32 %v895_v28, %v878_v2  ;;  %v917_v35 = vsel %vm914_vm2, %v915_v19, %v916_v23  ;;  %v809_v38 = vpop.f32.mrb[8].mxu1 }
 0x10e   : > { %v611_v36 = vmax.f32 %v2141_v32, 0.0  ;;  %v586_v37 = vpop.f32.mrb[9].mxu0  ;;  %v888_v40 = vmul.f32 %v2526_v53, %v871_v27  ;;  %v910_v41 = vmul.f32 %v2531_v54, %v871_v27  ;;  %v2585_v42 = vunpack.c.h.bf16 %v1956_v16  ;;  %v2169_v46 = vpop.f32.mrb[9].mxu1 }
 0x10f   : > { %v609_v43 = vmax.f32 %v586_v37, 0.0  ;;  %v2142_v44 = vpop.f32.mrb[10].mxu0  ;;  %v820_v45 = vmax.f32 %v809_v38, 0.0  ;;  %v922_v47 = vadd.f32 %v917_v35, %v900_v34  ;;  %v938_v48 = vmul.f32 %v2568_v30, %v2563_v26  ;;  %v812_v52 = vpop.f32.mrb[10].mxu1 }
 0x110   : > { %v612_v49 = vmax.f32 %v2142_v44, 0.0  ;;  %v589_v50 = vpop.f32.mrb[11].mxu0  ;;  %v896_v55 = vrot.slane %v888_v40, 1  ;;  %v918_v56 = vrot.slane %v910_v41, 2  ;;  %v948_v58 = vmul.f32 %v2568_v30, %v2575_v33  ;;  %v2170_v62 = vpop.f32.mrb[11].mxu1 }
 0x111   : > { %v610_v59 = vmax.f32 %v589_v50, 0.0  ;;  %v821_v60 = vmax.f32 %v812_v52, 0.0  ;;  %v949_v63 = vmul.f32 %v2570_v31, %v2575_v33  ;;  %v969_v0 = vmul.f32 %v2568_v30, %v2581_v39 }
 0x112   : > { %v1966_v1 = vpack.c.bf16 %v612_v49, %v611_v36  ;;  %v897_v2 = vsel %vm892_vm1, %v894_v18, %v896_v55  ;;  %v919_v4 = vsel %vm914_vm2, %v916_v23, %v918_v56  ;;  %v954_v5 = vrot.slane %v948_v58, 1  ;;  %v2616_v18 = vld [vmem:[%s2871_s3 + $0x8] ss:$0 sm:$0xff] }
 0x113   : > { %v1961_v6 = vpack.c.bf16 %v610_v59, %v609_v43  ;;  %v2597_v8 = vpack.c.bf16 %v821_v60, %v820_v45  ;;  %v901_v10 = vadd.f32 %v897_v2, %v2539_v3  ;;  %v956_v11 = vrot.slane %v949_v63, 1  ;;  %v2609_v14 = vld [vmem:[#allocation2 + $0xc] ss:$44 sps:$4 sm:$0xff]  }
 0x114   : > { %v2605_v12 = vunpack.c.l.bf16 %v1966_v1  ;;  %v2607_v13 = vunpack.c.h.bf16 %v1966_v1  ;;  %v970_v16 = vmul.f32 %v2570_v31, %v2581_v39  ;;  %v975_v17 = vrot.slane %v969_v0, 2 }
 0x115   : > { %2064 = vst [vmem:[#allocation2 + $0x20] sm:$0xff] %v1961_v6   ;;  %v923_v19 = vadd.f32 %v919_v4, %v901_v10  ;;  %v928_v3 = vunpack.c.l.bf16 %v2609_v14  ;;  %v957_v20 = vsel %vm892_vm1, %v954_v5, %v956_v11  ;;  %v996_v21 = vmul.f32 %v2566_v29, %v2544_v7 }
 0x116   : > { %v977_v22 = vrot.slane %v970_v16, 2  ;;  %v997_v23 = vmul.f32 %v2585_v42, %v2544_v7  ;;  %v1006_v27 = vmul.f32 %v2566_v29, %v2602_v9  ;;  %v1007_v28 = vmul.f32 %v2585_v42, %v2602_v9 }
 0x117   : > { %v937_v32 = vmul.f32 %v2563_v26, %v928_v3  ;;  %v940_v34 = vadd.f32 %v938_v48, %v923_v19  ;;  %v947_v35 = vmul.f32 %v2575_v33, %v928_v3  ;;  %v968_v36 = vmul.f32 %v2581_v39, %v928_v3 }
 0x118   : > { %v978_v37 = vsel %vm914_vm2, %v975_v17, %v977_v22  ;;  %v1012_v38 = vrot.slane %v1006_v27, 1  ;;  %v1013_v40 = vrot.slane %v1007_v28, 1  ;;  %v1027_v41 = vmul.f32 %v2566_v29, %v2616_v18 }
 0x119   : > { %v939_v43 = vadd.f32 %v937_v32, %v922_v47  ;;  %v953_v44 = vrot.slane %v947_v35, 1  ;;  %v961_v45 = vadd.f32 %v957_v20, %v940_v34  ;;  %v974_v46 = vrot.slane %v968_v36, 2 }
 0x11a   : > { %v1014_v49 = vsel %vm892_vm1, %v1012_v38, %v1013_v40  ;;  %v1028_v48 = vmul.f32 %v2585_v42, %v2616_v18  ;;  %v1033_v50 = vrot.slane %v1027_v41, 2  ;;  %v1060_v52 = vmul.f32 %v2521_v51, %v2558_v25 }
 0x11b   : > { %v955_v55 = vsel %vm892_vm1, %v953_v44, %v954_v5  ;;  %v976_v56 = vsel %vm914_vm2, %v974_v46, %v975_v17  ;;  %v982_v58 = vadd.f32 %v978_v37, %v961_v45  ;;  %v1061_v47 = vmul.f32 %v2568_v30, %v2521_v51 }
 0x11c   : > { %v1303_v59 = vld [vmem:[#allocation2 + $0x20] sm:$0xff]   ;;  %v960_v60 = vadd.f32 %v955_v55, %v939_v43  ;;  %v1034_v62 = vrot.slane %v1028_v48, 2  ;;  %v1062_v63 = vmul.f32 %v2526_v53, %v2558_v25  ;;  %v1063_v0 = vmul.f32 %v2568_v30, %v2526_v53 }
 0x11d   : > { %v2647_v1 = vunpack.c.h.bf16 %v1303_v59  ;;  %v989_v2 = vunpack.c.l.bf16 %v1303_v59  ;;  %v999_v4 = vadd.f32 %v997_v23, %v982_v58  ;;  %v1064_v5 = vmul.f32 %v2570_v31, %v2526_v53  ;;  %v1094_v32 = vld [vmem:[#allocation2 + $0x20] sm:$0xff]  }
 0x11e   : > { %v981_v6 = vadd.f32 %v976_v56, %v960_v60  ;;  %v1035_v10 = vsel %vm914_vm2, %v1033_v50, %v1034_v62  ;;  %v1068_v11 = vrot.slane %v1062_v63, 1  ;;  %v1069_v16 = vrot.slane %v1063_v0, 1 }
 0x11f   : > { %v1008_v17 = vmul.f32 %v2602_v9, %v989_v2  ;;  %v1029_v19 = vmul.f32 %v2616_v18, %v989_v2  ;;  %v1071_v3 = vrot.slane %v1064_v5, 1  ;;  %v1077_v20 = vmul.f32 %v2531_v54, %v2558_v25  ;;  %v2665_v25 = vld [vmem:[%s2872_s4] ss:$0 sm:$0xff] }
 0x120   : > { %v998_v22 = vadd.f32 %v996_v21, %v981_v6  ;;  %v1070_v27 = vsel %vm892_vm1, %v1068_v11, %v1069_v16  ;;  %v1078_v23 = vmul.f32 %v2568_v30, %v2531_v54  ;;  %v1079_v28 = vmul.f32 %v2570_v31, %v2531_v54 }
 0x121   : > { %v1015_v34 = vrot.slane %v1008_v17, 1  ;;  %v1036_v35 = vrot.slane %v1029_v19, 2  ;;  %v1072_v36 = vsel %vm892_vm1, %v1069_v16, %v1071_v3  ;;  %v1075_v37 = vadd.f32 %v1070_v27, %v1060_v52 }
 0x122   : > { %v1019_v38 = vadd.f32 %v1014_v49, %v998_v22  ;;  %v1076_v41 = vadd.f32 %v1072_v36, %v1061_v47  ;;  %v1083_v43 = vrot.slane %v1077_v20, 2  ;;  %v1084_v44 = vrot.slane %v1078_v23, 2 }
 0x123   : > { %v1016_v30 = vsel %vm892_vm1, %v1013_v40, %v1015_v34  ;;  %v1037_v21 = vsel %vm914_vm2, %v1034_v62, %v1036_v35  ;;  %v1086_v31 = vrot.slane %v1079_v28, 2  ;;  %v1097_v45 = vunpack.c.l.bf16 %v1094_v32 }
 0x124   : > { %v1020_v46 = vadd.f32 %v1016_v30, %v999_v4  ;;  %v1040_v48 = vadd.f32 %v1035_v10, %v1019_v38  ;;  %v1085_v50 = vsel %vm914_vm2, %v1083_v43, %v1084_v44  ;;  %v1098_v49 = vmul.f32 %v2566_v29, %v2563_v26 }
 0x125   : > { %v1087_v52 = vsel %vm914_vm2, %v1084_v44, %v1086_v31  ;;  %v1090_v55 = vadd.f32 %v1085_v50, %v1075_v37  ;;  %v1099_v56 = vmul.f32 %v2585_v42, %v2563_v26  ;;  %v1102_v40 = vmul.f32 %v2566_v29, %v2575_v33 }
 0x126   : > { %v1041_v58 = vadd.f32 %v1037_v21, %v1020_v46  ;;  %v1048_v47 = vadd.f32 %v2665_v25, %v1040_v48  ;;  %v1091_v59 = vadd.f32 %v1087_v52, %v1076_v41  ;;  %v1103_v60 = vmul.f32 %v2585_v42, %v2575_v33  ;;  %v1181_v21 = vld [vmem:[#allocation2 + $0x20] sm:$0xff]  }
 0x127   : > { %v1100_v62 = vadd.f32 %v1098_v49, %v1090_v55  ;;  %v1104_v63 = vmul.f32 %v2575_v33, %v1097_v45  ;;  %v1108_v0 = vrot.slane %v1102_v40, 1  ;;  %v1117_v2 = vmul.f32 %v2566_v29, %v2581_v39 }
 0x128   : > { %v1049_v4 = vadd.f32 %v2665_v25, %v1041_v58  ;;  %v1050_v5 = vmax.f32 %v1048_v47, 0.0  ;;  %v1101_v6 = vadd.f32 %v1099_v56, %v1091_v59  ;;  %v1109_v10 = vrot.slane %v1103_v60, 1 }
 0x129   : > { %v1111_v11 = vrot.slane %v1104_v63, 1  ;;  %v1118_v16 = vmul.f32 %v2585_v42, %v2581_v39  ;;  %v1119_v17 = vmul.f32 %v2581_v39, %v1097_v45  ;;  %v1123_v19 = vrot.slane %v1117_v2, 2 }
 0x12a   : > { %v1051_v3 = vmax.f32 %v1049_v4, 0.0  ;;  %v1110_v20 = vsel %vm892_vm1, %v1108_v0, %v1109_v10  ;;  %v1136_v22 = vunpack.c.h.bf16 %v1094_v32  ;;  %v1140_v27 = vmul.f32 %v2605_v12, %v2544_v7 }
 0x12b   : > { %v1112_v23 = vsel %vm892_vm1, %v1109_v10, %v1111_v11  ;;  %v1115_v28 = vadd.f32 %v1110_v20, %v1100_v62  ;;  %v1124_v34 = vrot.slane %v1118_v16, 2  ;;  %v1126_v35 = vrot.slane %v1119_v17, 2 }
 0x12c   : > { %v1052_v36 = vpack.c.bf16 %v1051_v3, %v1050_v5  ;;  %v1116_v37 = vadd.f32 %v1112_v23, %v1101_v6  ;;  %v1139_v38 = vmul.f32 %v2544_v7, %v1136_v22  ;;  %v1143_v41 = vmul.f32 %v2602_v9, %v1136_v22 }
 0x12d   : > { %v1125_v43 = vsel %vm914_vm2, %v1123_v19, %v1124_v34  ;;  %v1127_v44 = vsel %vm914_vm2, %v1124_v34, %v1126_v35  ;;  %v1144_v32 = vmul.f32 %v2605_v12, %v2602_v9  ;;  %v1145_v30 = vmul.f32 %v2607_v13, %v2602_v9 }
 0x12e   : > { %2187 = vmatprep.mubr.bf16.mxu0 %v1052_v36  ;;  %v1130_v31 = vadd.f32 %v1125_v43, %v1115_v28  ;;  %v1131_v45 = vadd.f32 %v1127_v44, %v1116_v37  ;;  %v1149_v46 = vrot.slane %v1143_v41, 1  ;;  %v1158_v48 = vmul.f32 %v2616_v18, %v1136_v22 }
 0x12f   : > { %v1150_v50 = vrot.slane %v1144_v32, 1  ;;  %v1152_v49 = vrot.slane %v1145_v30, 1  ;;  %v1159_v52 = vmul.f32 %v2605_v12, %v2616_v18  ;;  %v1160_v55 = vmul.f32 %v2607_v13, %v2616_v18 }
 0x130   : > { %v1141_v56 = vadd.f32 %v1139_v38, %v1130_v31  ;;  %v1142_v40 = vadd.f32 %v1140_v27, %v1131_v45  ;;  %v1164_v58 = vrot.slane %v1158_v48, 2  ;;  %v1184_v47 = vunpack.c.l.bf16 %v1181_v21 }
 0x131   : > { %v1151_v59 = vsel %vm892_vm1, %v1149_v46, %v1150_v50  ;;  %v1153_v60 = vsel %vm892_vm1, %v1150_v50, %v1152_v49  ;;  %v1165_v62 = vrot.slane %v1159_v52, 2  ;;  %v1167_v63 = vrot.slane %v1160_v55, 2 }
 0x132   : > { %v1156_v0 = vadd.f32 %v1151_v59, %v1141_v56  ;;  %v1157_v2 = vadd.f32 %v1153_v60, %v1142_v40  ;;  %v1185_v4 = vmul.f32 %v2566_v29, %v2521_v51  ;;  %v1186_v5 = vmul.f32 %v2585_v42, %v2521_v51 }
 0x133   : > { %v1166_v6 = vsel %vm914_vm2, %v1164_v58, %v1165_v62  ;;  %v1168_v10 = vsel %vm914_vm2, %v1165_v62, %v1167_v63  ;;  %v1187_v11 = vmul.f32 %v2566_v29, %v2526_v53  ;;  %v1188_v16 = vmul.f32 %v2585_v42, %v2526_v53 }
 0x134   : > { %v1171_v17 = vadd.f32 %v1166_v6, %v1156_v0  ;;  %v1172_v19 = vadd.f32 %v1168_v10, %v1157_v2  ;;  %v1189_v3 = vmul.f32 %v2526_v53, %v1184_v47  ;;  %v1202_v20 = vmul.f32 %v2566_v29, %v2531_v54 }
 0x135   : > { %v1193_v22 = vrot.slane %v1187_v11, 1  ;;  %v1194_v27 = vrot.slane %v1188_v16, 1  ;;  %v1203_v23 = vmul.f32 %v2585_v42, %v2531_v54  ;;  %v1204_v28 = vmul.f32 %v2531_v54, %v1184_v47  ;;  %v2737_v47 = vld [vmem:[#allocation2 + $0x38] sm:$0xff]  }
 0x136   : > { %v1173_v34 = vadd.f32 %v2665_v25, %v1171_v17  ;;  %v1174_v35 = vadd.f32 %v2665_v25, %v1172_v19  ;;  %v1196_v36 = vrot.slane %v1189_v3, 1  ;;  %v1208_v37 = vrot.slane %v1202_v20, 2 }
 0x137   : > { %v1195_v38 = vsel %vm892_vm1, %v1193_v22, %v1194_v27  ;;  %v1209_v41 = vrot.slane %v1203_v23, 2  ;;  %v1211_v43 = vrot.slane %v1204_v28, 2  ;;  %v1220_v44 = vunpack.c.h.bf16 %v1181_v21 }
 0x138   : > { %v1175_v32 = vmax.f32 %v1173_v34, 0.0  ;;  %v1176_v29 = vmax.f32 %v1174_v35, 0.0  ;;  %v1197_v30 = vsel %vm892_vm1, %v1194_v27, %v1196_v36  ;;  %v1200_v31 = vadd.f32 %v1195_v38, %v1185_v4 }
 0x139   : > { %v1201_v45 = vadd.f32 %v1197_v30, %v1186_v5  ;;  %v1210_v42 = vsel %vm914_vm2, %v1208_v37, %v1209_v41  ;;  %v1212_v46 = vsel %vm914_vm2, %v1209_v41, %v1211_v43  ;;  %v1223_v48 = vmul.f32 %v2563_v26, %v1220_v44 }
 0x13a   : > { %v1177_v50 = vpack.c.bf16 %v1176_v29, %v1175_v32  ;;  %v1215_v49 = vadd.f32 %v1210_v42, %v1200_v31  ;;  %v1224_v52 = vmul.f32 %v2605_v12, %v2563_v26  ;;  %v1227_v55 = vmul.f32 %v2575_v33, %v1220_v44 }
 0x13b   : > { %v1216_v21 = vadd.f32 %v1212_v46, %v1201_v45  ;;  %v1228_v56 = vmul.f32 %v2605_v12, %v2575_v33  ;;  %v1229_v40 = vmul.f32 %v2607_v13, %v2575_v33  ;;  %v1242_v58 = vmul.f32 %v2581_v39, %v1220_v44 }
 0x13c   : > { %2188 = vmatmul.mubr.bf16.vlgmr.msra.gmra.mrb[12].mxu0 %v1177_v50  ;;  %v1225_v59 = vadd.f32 %v1223_v48, %v1215_v49  ;;  %v1233_v60 = vrot.slane %v1227_v55, 1  ;;  %v1243_v62 = vmul.f32 %v2605_v12, %v2581_v39  ;;  %v1244_v63 = vmul.f32 %v2607_v13, %v2581_v39 }
 0x13d   : > { %v1226_v0 = vadd.f32 %v1224_v52, %v1216_v21  ;;  %v1234_v2 = vrot.slane %v1228_v56, 1  ;;  %v1236_v4 = vrot.slane %v1229_v40, 1  ;;  %v1248_v5 = vrot.slane %v1242_v58, 2 }
 0x13e   : > { %v1249_v6 = vrot.slane %v1243_v62, 2  ;;  %v1251_v10 = vrot.slane %v1244_v63, 2  ;;  %v1262_v11 = vunpack.c.l.bf16 %v2737_v47  ;;  %v1267_v16 = vmul.f32 %v2533_v57, %v2602_v9 }
 0x13f   : > { %v1235_v17 = vsel %vm892_vm1, %v1233_v60, %v1234_v2  ;;  %v1237_v19 = vsel %vm892_vm1, %v1234_v2, %v1236_v4  ;;  %v1268_v3 = vmul.f32 %v2535_v61, %v2602_v9  ;;  %v1282_v20 = vmul.f32 %v2533_v57, %v2616_v18 }
 0x140   : > { %v1240_v22 = vadd.f32 %v1235_v17, %v1225_v59  ;;  %v1241_v27 = vadd.f32 %v1237_v19, %v1226_v0  ;;  %v1250_v23 = vsel %vm914_vm2, %v1248_v5, %v1249_v6  ;;  %v1252_v28 = vsel %vm914_vm2, %v1249_v6, %v1251_v10 }
 0x141   : > { %v1269_v34 = vmul.f32 %v2602_v9, %v1262_v11  ;;  %v1273_v35 = vrot.slane %v1267_v16, 1  ;;  %v1274_v36 = vrot.slane %v1268_v3, 1  ;;  %v1283_v37 = vmul.f32 %v2535_v61, %v2616_v18 }
 0x142   : > { %v1255_v38 = vadd.f32 %v1250_v23, %v1240_v22  ;;  %v1256_v41 = vadd.f32 %v1252_v28, %v1241_v27  ;;  %v1284_v43 = vmul.f32 %v2616_v18, %v1262_v11  ;;  %v1288_v44 = vrot.slane %v1282_v20, 2 }
 0x143   : > { %v1275_v32 = vsel %vm892_vm1, %v1273_v35, %v1274_v36  ;;  %v1276_v29 = vrot.slane %v1269_v34, 1  ;;  %v1289_v30 = vrot.slane %v1283_v37, 2  ;;  %v1309_v31 = vmul.f32 %v2521_v51, %v2647_v1 }
 0x144   : > { %v1265_v45 = vadd.f32 %v2552_v15, %v1255_v38  ;;  %v1266_v42 = vadd.f32 %v2556_v24, %v1256_v41  ;;  %v1291_v46 = vrot.slane %v1284_v43, 2  ;;  %v1310_v48 = vmul.f32 %v2605_v12, %v2521_v51 }
 0x145   : > { %v1277_v50 = vsel %vm892_vm1, %v1274_v36, %v1276_v29  ;;  %v1290_v49 = vsel %vm914_vm2, %v1288_v44, %v1289_v30  ;;  %v1311_v52 = vmul.f32 %v2526_v53, %v2647_v1  ;;  %v1312_v55 = vmul.f32 %v2605_v12, %v2526_v53 }
 0x146   : > { %v1280_v21 = vadd.f32 %v1275_v32, %v1265_v45  ;;  %v1281_v56 = vadd.f32 %v1277_v50, %v1266_v42  ;;  %v1292_v15 = vsel %vm914_vm2, %v1289_v30, %v1291_v46  ;;  %v1313_v24 = vmul.f32 %v2607_v13, %v2526_v53 }
 0x147   : > { %v1317_v40 = vrot.slane %v1311_v52, 1  ;;  %v1318_v58 = vrot.slane %v1312_v55, 1  ;;  %v1326_v51 = vmul.f32 %v2531_v54, %v2647_v1  ;;  %v1327_v59 = vmul.f32 %v2605_v12, %v2531_v54 }
 0x148   : > { %v1295_v60 = vadd.f32 %v1290_v49, %v1280_v21  ;;  %v1296_v62 = vadd.f32 %v1292_v15, %v1281_v56  ;;  %v1320_v63 = vrot.slane %v1313_v24, 1  ;;  %v1328_v0 = vmul.f32 %v2607_v13, %v2531_v54 }
 0x149   : > { %v1319_v2 = vsel %vm892_vm1, %v1317_v40, %v1318_v58  ;;  %v1332_v4 = vrot.slane %v1326_v51, 2  ;;  %v1333_v5 = vrot.slane %v1327_v59, 2  ;;  %v1346_v53 = vunpack.c.h.bf16 %v2609_v14 }
 0x14a   : > { %v1297_v6 = vadd.f32 %v2665_v25, %v1295_v60  ;;  %v1298_v10 = vadd.f32 %v2665_v25, %v1296_v62  ;;  %v1321_v1 = vsel %vm892_vm1, %v1318_v58, %v1320_v63  ;;  %v1324_v11 = vadd.f32 %v1319_v2, %v1309_v31 }
 0x14b   : > { %v1325_v12 = vadd.f32 %v1321_v1, %v1310_v48  ;;  %v1334_v16 = vsel %vm914_vm2, %v1332_v4, %v1333_v5  ;;  %v1335_v17 = vrot.slane %v1328_v0, 2  ;;  %v1347_v54 = vmul.f32 %v2533_v57, %v2563_v26 }
 0x14c   : > { %v1299_v13 = vmax.f32 %v1297_v6, 0.0  ;;  %v1300_v19 = vmax.f32 %v1298_v10, 0.0  ;;  %v1339_v3 = vadd.f32 %v1334_v16, %v1324_v11  ;;  %v1348_v14 = vmul.f32 %v2535_v61, %v2563_v26 }
 0x14d   : > { %v1336_v20 = vsel %vm914_vm2, %v1333_v5, %v1335_v17  ;;  %v1351_v22 = vmul.f32 %v2533_v57, %v2575_v33  ;;  %v1352_v27 = vmul.f32 %v2535_v61, %v2575_v33  ;;  %v1353_v23 = vmul.f32 %v2575_v33, %v1346_v53  ;;  %v2074_v17 = vld [vmem:[%s2446_s19 + $0x18] sm:$0xff]  }
 0x14e   : > { %v1301_v28 = vpack.c.bf16 %v1300_v19, %v1299_v13  ;;  %v1340_v34 = vadd.f32 %v1336_v20, %v1325_v12  ;;  %v1349_v35 = vadd.f32 %v1347_v54, %v1339_v3  ;;  %v1366_v36 = vmul.f32 %v2533_v57, %v2581_v39  ;;  %v1886_v54 = vld [vmem:[%s2446_s19 + $0xc] sm:$0xff]   ;;  %v1891_v13 = vld [vmem:[%s2446_s19 + $0x20] sm:$0x1] }
 0x14f   : > { %v1357_v37 = vrot.slane %v1351_v22, 1  ;;  %v1358_v38 = vrot.slane %v1352_v27, 1  ;;  %v1360_v41 = vrot.slane %v1353_v23, 1  ;;  %v1367_v26 = vmul.f32 %v2535_v61, %v2581_v39 }
 0x150   : > { %2191 = vmatprep.mubr.bf16.mxu1 %v1301_v28  ;;  %v1350_v43 = vadd.f32 %v1348_v14, %v1340_v34  ;;  %v1368_v44 = vmul.f32 %v2581_v39, %v1346_v53  ;;  %v1372_v32 = vrot.slane %v1366_v36, 2  ;;  %v2029_v29 = vunpack.c.l.bf16 %v2597_v8  ;;  %v1888_v14 = vld [vmem:[%s2446_s19 + $0x14] sm:$0x1]  ;;  %v1877_v36 = vld [vmem:[%s2874_s6] ss:$0 sm:$0xff] }
 0x151   : > { %v1359_v33 = vsel %vm892_vm1, %v1357_v37, %v1358_v38  ;;  %v1361_v30 = vsel %vm892_vm1, %v1358_v38, %v1360_v41  ;;  %v1373_v31 = vrot.slane %v1367_v26, 2  ;;  %v2030_v57 = vunpack.c.h.bf16 %v2597_v8 }
 0x152   : > { %v1364_v45 = vadd.f32 %v1359_v33, %v1349_v35  ;;  %v1365_v42 = vadd.f32 %v1361_v30, %v1350_v43  ;;  %v1375_v46 = vrot.slane %v1368_v44, 2  ;;  %v1385_v48 = vunpack.c.h.bf16 %v2737_v47 }
 0x153   : > { %v1374_v61 = vsel %vm914_vm2, %v1372_v32, %v1373_v31  ;;  %v1389_v50 = vmul.f32 %v2029_v29, %v2544_v7  ;;  %v1393_v39 = vmul.f32 %v2029_v29, %v2602_v9  ;;  %v1394_v49 = vmul.f32 %v2030_v57, %v2602_v9 }
 0x154   : > { %v1376_v52 = vsel %vm914_vm2, %v1373_v31, %v1375_v46  ;;  %v1379_v55 = vadd.f32 %v1374_v61, %v1364_v45  ;;  %v1388_v21 = vmul.f32 %v2544_v7, %v1385_v48  ;;  %v1392_v8 = vmul.f32 %v2602_v9, %v1385_v48 }
 0x155   : > { %v1380_v56 = vadd.f32 %v1376_v52, %v1365_v42  ;;  %v1399_v15 = vrot.slane %v1393_v39, 1  ;;  %v1401_v24 = vrot.slane %v1394_v49, 1  ;;  %v1407_v47 = vmul.f32 %v2616_v18, %v1385_v48 }
 0x156   : > { %v1390_v40 = vadd.f32 %v1388_v21, %v1379_v55  ;;  %v1398_v58 = vrot.slane %v1392_v8, 1  ;;  %v1408_v51 = vmul.f32 %v2029_v29, %v2616_v18  ;;  %v1409_v59 = vmul.f32 %v2030_v57, %v2616_v18 }
 0x157   : > { %v1391_v60 = vadd.f32 %v1389_v50, %v1380_v56  ;;  %v1402_v62 = vsel %vm892_vm1, %v1399_v15, %v1401_v24  ;;  %v1413_v63 = vrot.slane %v1407_v47, 2  ;;  %v2033_v19 = vunpack.c.l.bf16 %v2074_v17  ;;  %v2036_v56 = vld [vmem:[%s2465_s10] sm:$0xff]   ;;  %v1579_v24 = vld [vmem:[%s2465_s10 + $0x8] sm:$0x1] }
 0x158   : > { %v1400_v7 = vsel %vm892_vm1, %v1398_v58, %v1399_v15  ;;  %v1414_v9 = vrot.slane %v1408_v51, 2  ;;  %v1416_v0 = vrot.slane %v1409_v59, 2  ;;  %v2034_v3 = vunpack.c.h.bf16 %v2074_v17  ;;  %v1892_v15 = vld [vmem:[%s2446_s19 + $0x24] sm:$0xff]   ;;  %v1894_v58 = vld [vmem:[%s2446_s19 + $0x2c] sm:$0x1] }
 0x159   : > { %v1405_v2 = vadd.f32 %v1400_v7, %v1390_v40  ;;  %v1406_v4 = vadd.f32 %v1402_v62, %v1391_v60  ;;  %v1580_v20 = vunpack.c.l.bf16 %v1886_v54  ;;  %v1581_v22 = vunpack.c.h.bf16 %v1886_v54 }
 0x15a   : > { %v1415_v5 = vsel %vm914_vm2, %v1413_v63, %v1414_v9  ;;  %v1417_v53 = vsel %vm914_vm2, %v1414_v9, %v1416_v0  ;;  %v1585_v27 = vunpack.c.l.bf16 %v1891_v13  ;;  %v1582_v23 = vunpack.c.l.bf16 %v1888_v14 }
 0x15b   : > { %v1420_v18 = vadd.f32 %v1415_v5, %v1405_v2  ;;  %v1421_v6 = vadd.f32 %v1417_v53, %v1406_v4  ;;  %v1609_v28 = vrot.slane %v2033_v19, 1  ;;  %v1610_v34 = vrot.slane %v2034_v3, 1 }
 0x15c   : > { %v1605_v35 = vrot.slane %v1581_v22, 1  ;;  %v1612_v37 = vrot.slane %v1585_v27, 1  ;;  %v1607_v38 = vrot.slane %v1582_v23, 1  ;;  %v2037_v47 = vunpack.c.l.bf16 %v2036_v56 }
 0x15d   : > { %v1422_v10 = vadd.f32 %v2665_v25, %v1420_v18  ;;  %v1423_v1 = vadd.f32 %v2665_v25, %v1421_v6  ;;  %v1604_v25 = vrot.slane %v1580_v20, 1  ;;  %v1611_v26 = vsel %vm892_vm1, %v1609_v28, %v1610_v34 }
 0x15e   : > { %v1613_v30 = vsel %vm892_vm1, %v1610_v34, %v1612_v37  ;;  %v1608_v42 = vsel %vm892_vm1, %v1605_v35, %v1607_v38  ;;  %v2038_v40 = vunpack.c.h.bf16 %v2036_v56  ;;  %v1586_v51 = vunpack.c.l.bf16 %v1892_v15 }
 0x15f   : > { %v1424_v11 = vmax.f32 %v1422_v10, 0.0  ;;  %v1425_v12 = vmax.f32 %v1423_v1, 0.0  ;;  %v1606_v32 = vsel %vm892_vm1, %v1604_v25, %v1605_v35  ;;  %v1587_v59 = vunpack.c.h.bf16 %v1892_v15 }
 0x160   : > { %v1591_v60 = vunpack.c.l.bf16 %v1579_v24  ;;  %v1588_v62 = vunpack.c.l.bf16 %v1894_v58  ;;  %v1619_v63 = vrot.slane %v2037_v47, 1  ;;  %v1620_v7 = vrot.slane %v2038_v40, 1 }
 0x161   : > { %v1426_v16 = vpack.c.bf16 %v1425_v12, %v1424_v11  ;;  %v1614_v9 = vrot.slane %v1586_v51, 1  ;;  %v1615_v0 = vrot.slane %v1587_v59, 1 }
 0x162   : > { %v1622_v2 = vrot.slane %v1591_v60, 1  ;;  %v1617_v4 = vrot.slane %v1588_v62, 1  ;;  %v1621_v53 = vsel %vm892_vm1, %v1619_v63, %v1620_v7 }
 0x163   : > { %2192 = vmatmul.mubr.bf16.vlgmr.msra.gmra.mrb[12].mxu1 %v1426_v16  ;;  %v1616_v10 = vsel %vm892_vm1, %v1614_v9, %v1615_v0 }
 0x164   : > { %v1623_v12 = vsel %vm892_vm1, %v1620_v7, %v1622_v2  ;;  %v1618_v13 = vsel %vm892_vm1, %v1615_v0, %v1617_v4 }
 0x20f   : > { %v2189_v41 = vpop.f32.mrb[12].mxu0 }
 0x210   : > { %v1545_v43 = vadd.f32 %v2189_v41, %v1877_v36  ;;  %v1536_v44 = vpop.f32.mrb[13].mxu0 }
 0x211   : > { %v1537_v29 = vadd.f32 %v1877_v36, %v1536_v44  ;;  %v2190_v33 = vpop.f32.mrb[14].mxu0 }
 0x212   : > { %v1634_v31 = vadd.f32 %v1611_v26, %v1545_v43  ;;  %v1548_v57 = vadd.f32 %v2190_v33, %v1877_v36  ;;  %v1539_v45 = vpop.f32.mrb[15].mxu0 }
 0x213   : > { %v1632_v46 = vadd.f32 %v1606_v32, %v1537_v29  ;;  %v1540_v48 = vadd.f32 %v1877_v36, %v1539_v45 }
 0x214   : > { %v1635_v61 = vadd.f32 %v1613_v30, %v1548_v57  ;;  %v1642_v39 = vmax.f32 %v1634_v31, 0.0 }
 0x215   : > { %v1633_v50 = vadd.f32 %v1608_v42, %v1540_v48  ;;  %v1640_v52 = vmax.f32 %v1632_v46, 0.0 }
 0x216   : > { %v1643_v49 = vmax.f32 %v1635_v61, 0.0 }
 0x217   : > { %v1641_v55 = vmax.f32 %v1633_v50, 0.0 }
 0x218   : > { %v2047_v21 = vpack.c.bf16 %v1643_v49, %v1642_v39 }
 0x219   : > { %v2042_v8 = vpack.c.bf16 %v1641_v55, %v1640_v52 }
 0x21a   : > { %2075 = vst [vmem:[%s2839_s9 + $0x8] sm:$0xff] %v2047_v21  }
 0x21b   : > { %2043 = vst [vmem:[%s2839_s9] sm:$0xff] %v2042_v8  }
 0x236   : > { %v2193_v5 = vpop.f32.mrb[12].mxu1 }
 0x237   : > { %v1561_v18 = vadd.f32 %v2193_v5, %v1877_v36  ;;  %v1552_v6 = vpop.f32.mrb[13].mxu1 }
 0x238   : > { %v1553_v1 = vadd.f32 %v1877_v36, %v1552_v6  ;;  %v2194_v11 = vpop.f32.mrb[14].mxu1 }
 0x239   : > { %v1638_v16 = vadd.f32 %v1621_v53, %v1561_v18  ;;  %v1564_v17 = vadd.f32 %v2194_v11, %v1877_v36  ;;  %v1555_v54 = vpop.f32.mrb[15].mxu1 }
 0x23a   : > { %v1636_v19 = vadd.f32 %v1616_v10, %v1553_v1  ;;  %v1556_v3 = vadd.f32 %v1877_v36, %v1555_v54 }
 0x23b   : > { %v1639_v14 = vadd.f32 %v1623_v12, %v1564_v17  ;;  %v1646_v22 = vmax.f32 %v1638_v16, 0.0 }
 0x23c   : > { %v1637_v20 = vadd.f32 %v1618_v13, %v1556_v3  ;;  %v1644_v23 = vmax.f32 %v1636_v19, 0.0 }
 0x23d   : > { %v1647_v27 = vmax.f32 %v1639_v14, 0.0 }
 0x23e   : > { %v1645_v28 = vmax.f32 %v1637_v20, 0.0 }
 0x23f   : > { %v2057_v34 = vpack.c.bf16 %v1647_v27, %v1646_v22 }
 0x240   : > { %v2052_v25 = vpack.c.bf16 %v1645_v28, %v1644_v23 }
 0x241   : > { %2077 = vst [vmem:[%s2839_s9 + $0x18] sm:$0xff] %v2057_v34  }
 0x242   : > { %2076 = vst [vmem:[%s2839_s9 + $0x10] sm:$0xff] %v2052_v25  }
 0x243 PF: > { %s17_s28 = sadd.s32 1, %s2327_s28   ;;  %s2876_s24 = smov %s2319_s26 }
 0x244   : > { %p14_p9 = scmp.ge.s32.totalorder %s17_s28, 10   ;;  %s2877_s25 = smov %s2323_s27 }
 0x245   : > { %s2878_s26 = smov %s2881_s29  ;;  %s2879_s27 = smov %s2885_s30 }
 0x246   :  { %16 = sbr.rel (!%p14_p9) target bundleno = 3 (0x3), region = 87 }

</bundles_post_ra>
